<compile_context>
chip_gen: v5e
topology: v5e:2x2
jax: 0.10.0
libtpu: 0.0.40
codegen_flags: <defaults>
</compile_context>

<pallas_src>
import functools

import jax
import jax.numpy as jnp
from jax.experimental import pallas as pl
from jax.experimental.pallas import tpu as pltpu

_BN_EPS = 1e-5  # torch.nn.BatchNorm2d default


# ----------------------------------------------------------------------------
# In-kernel math helpers
# ----------------------------------------------------------------------------
def _erf(x):
    # Abramowitz & Stegun 7.1.26, |err| < 1.5e-7 in f32.  Kept hand-rolled
    # because an erf primitive is not guaranteed to lower on Mosaic; the exp()
    # runs on the EUP so only the short polynomial touches the VALU.
    p = 0.3275911
    a1, a2, a3, a4, a5 = (0.254829592, -0.284496736, 1.421413741,
                          -1.453152027, 1.061405429)
    sgn = jnp.where(x >= 0.0, 1.0, -1.0)
    ax = jnp.abs(x)
    t = 1.0 / (1.0 + p * ax)
    poly = ((((a5 * t + a4) * t + a3) * t + a2) * t + a1) * t
    return sgn * (1.0 - poly * jnp.exp(-ax * ax))


def _gelu(x):
    # matches torch.nn.GELU() (erf formulation)
    return 0.5 * x * (1.0 + _erf(x * 0.7071067811865476))


def _cparams():
    return pltpu.CompilerParams(
        dimension_semantics=("parallel",),          # megacore split over batch (v7x)
        vmem_limit_bytes=32 * 1024 * 1024,          # explicit budget (v5e/v7x safe)
    )


# ----------------------------------------------------------------------------
# Pallas kernels
# ----------------------------------------------------------------------------
def _convt_kernel(x_ref, a_ref, b_ref, o_ref):
    # ConvTranspose2d(k=2, s=2): one lane-dense matmul per image.
    # x_ref: (1, H, W*Cin) bf16; a_ref: (W*Cin, 4*W*Co) bf16; b_ref: (1, 4*W*Co) f32
    y = jnp.dot(x_ref[0], a_ref[...], preferred_element_type=jnp.float32)
    o_ref[0] = (y + b_ref[...]).astype(o_ref.dtype)


def _conv3x3_kernel(x_ref, s_ref, t_ref, a_ref, b_ref,
                    y_ref, ps_ref, pss_ref, *, apply_act):
    # Fused: [BN+GELU of previous layer] -> 3x3 conv (+bias) -> partial BN stats.
    # x_ref:  (1, H, W*Cin) bf16   pre-norm output of the previous layer
    # s_ref/t_ref: (1, W*Cin) f32  per-lane BN scale/shift of the previous layer
    # a_ref:  (3, W*Cin, W*Co) bf16 expanded (banded) conv weights, one per kh
    # b_ref:  (1, W*Co) f32        bias tiled over W
    # y_ref:  (1, H, W*Co) bf16    pre-norm conv output
    # ps/pss: (1, 1, W*Co) f32     per-image partial sum / sum of squares
    H = x_ref.shape[1]
    x = x_ref[0].astype(jnp.float32)
    if apply_act:                                    # fused BN + GELU (prev layer)
        x = _gelu(x * s_ref[...] + t_ref[...])
    xb = x.astype(jnp.bfloat16)

    p0 = jnp.dot(xb, a_ref[0], preferred_element_type=jnp.float32)
    p1 = jnp.dot(xb, a_ref[1], preferred_element_type=jnp.float32)
    p2 = jnp.dot(xb, a_ref[2], preferred_element_type=jnp.float32)

    # kh = 0 / 2 taps: exact 0/1 shift matrices; their zero rows realize the
    # H zero-padding (W zero-padding is already folded into the banded weight).
    r = jax.lax.broadcasted_iota(jnp.int32, (H, H), 0)
    c = jax.lax.broadcasted_iota(jnp.int32, (H, H), 1)
    sdn = (r == c + 1).astype(jnp.float32)           # out[h] += p0[h-1]
    sup = (c == r + 1).astype(jnp.float32)           # out[h] += p2[h+1]

    acc = p1 + b_ref[...]
    acc = acc + jnp.dot(sdn, p0, preferred_element_type=jnp.float32)
    acc = acc + jnp.dot(sup, p2, preferred_element_type=jnp.float32)

    y_ref[0] = acc.astype(y_ref.dtype)
    ps_ref[0] = jnp.sum(acc, axis=0, keepdims=True)
    pss_ref[0] = jnp.sum(acc * acc, axis=0, keepdims=True)


def _bn_gelu_kernel(y_ref, s_ref, t_ref, o_ref):
    # Final epilogue: BN (batch stats) + GELU of the last conv output.
    y = y_ref[0].astype(jnp.float32)
    o_ref[0] = _gelu(y * s_ref[...] + t_ref[...]).astype(o_ref.dtype)


# ----------------------------------------------------------------------------
# pallas_call wrappers
# ----------------------------------------------------------------------------
def convt_matmul(x, a, b):
    N, H, WCin = x.shape
    K, Q = a.shape
    assert K == WCin
    return pl.pallas_call(
        _convt_kernel,
        out_shape=jax.ShapeDtypeStruct((N, H, Q), jnp.bfloat16),
        grid_spec=pltpu.PrefetchScalarGridSpec(
            num_scalar_prefetch=0,
            grid=(N,),
            in_specs=[pl.BlockSpec((1, H, WCin), lambda n: (n, 0, 0)),
                      pl.BlockSpec((K, Q), lambda n: (0, 0)),
                      pl.BlockSpec((1, Q), lambda n: (0, 0))],
            out_specs=pl.BlockSpec((1, H, Q), lambda n: (n, 0, 0)),
        ),
        compiler_params=_cparams(),
    )(x, a, b)


def conv3x3_stats(x, s, t, a, b, *, apply_act):
    N, H, WC = x.shape
    _, K, WCo = a.shape
    assert K == WC
    kern = functools.partial(_conv3x3_kernel, apply_act=apply_act)
    return pl.pallas_call(
        kern,
        out_shape=(jax.ShapeDtypeStruct((N, H, WCo), jnp.bfloat16),
                   jax.ShapeDtypeStruct((N, 1, WCo), jnp.float32),
                   jax.ShapeDtypeStruct((N, 1, WCo), jnp.float32)),
        grid_spec=pltpu.PrefetchScalarGridSpec(
            num_scalar_prefetch=0,
            grid=(N,),
            in_specs=[pl.BlockSpec((1, H, WC), lambda n: (n, 0, 0)),
                      pl.BlockSpec((1, WC), lambda n: (0, 0)),
                      pl.BlockSpec((1, WC), lambda n: (0, 0)),
                      pl.BlockSpec((3, WC, WCo), lambda n: (0, 0, 0)),
                      pl.BlockSpec((1, WCo), lambda n: (0, 0))],
            out_specs=(pl.BlockSpec((1, H, WCo), lambda n: (n, 0, 0)),
                       pl.BlockSpec((1, 1, WCo), lambda n: (n, 0, 0)),
                       pl.BlockSpec((1, 1, WCo), lambda n: (n, 0, 0))),
        ),
        compiler_params=_cparams(),
    )(x, s, t, a, b)


def bn_gelu(y, s, t):
    N, H, WCo = y.shape
    return pl.pallas_call(
        _bn_gelu_kernel,
        out_shape=jax.ShapeDtypeStruct((N, H, WCo), jnp.float32),
        grid_spec=pltpu.PrefetchScalarGridSpec(
            num_scalar_prefetch=0,
            grid=(N,),
            in_specs=[pl.BlockSpec((1, H, WCo), lambda n: (n, 0, 0)),
                      pl.BlockSpec((1, WCo), lambda n: (0, 0)),
                      pl.BlockSpec((1, WCo), lambda n: (0, 0))],
            out_specs=pl.BlockSpec((1, H, WCo), lambda n: (n, 0, 0)),
        ),
        compiler_params=_cparams(),
    )(y, s, t)


# ----------------------------------------------------------------------------
# XLA-side glue: weight expansion (once per layer, tiny) and BN finalization
# ----------------------------------------------------------------------------
def _expand_convt_weight(wt, W):
    # wt: (Cin, 2, 2, Cout)  == torch ConvTranspose2d weight (Cin, Cout, kH, kW)
    # permuted (0, 2, 3, 1).  Output columns are ordered [dh, 2*j + dw, cout] so
    # a contiguous reshape of the kernel output realizes the k=2/s=2 pixel
    # shuffle with no transpose pass.
    Cin, _, _, Co = wt.shape
    eye = jnp.eye(W, dtype=wt.dtype)
    parts = []
    for dh in range(2):
        b_dh = wt[:, dh].reshape(Cin, 2 * Co)            # [ci, dw*Co + co]
        parts.append(jnp.kron(eye, b_dh))                # (W*Cin, W*2*Co)
    return jnp.concatenate(parts, axis=1)                # (W*Cin, 4*W*Co)


def _expand_conv3x3_weight(w3, W):
    # w3: (3, 3, Cin, Cout) == torch Conv2d weight (Cout, Cin, kH, kW) permuted
    # (2, 3, 1, 0).  Returns (3, W*Cin, W*Cout): for each kh a block-banded
    # matrix carrying the kw taps and the zero W-padding, so the conv becomes
    # 3 lane-dense matmuls per image (no im2col, no in-kernel reshape).
    _, _, C, Co = w3.shape
    mats = []
    for kh in range(3):
        a_kh = jnp.zeros((W * C, W * Co), w3.dtype)
        for kw in range(3):
            band = jnp.eye(W, k=1 - kw, dtype=w3.dtype)  # input col w' = w+kw-1
            a_kh = a_kh + jnp.kron(band, w3[kh, kw])
        mats.append(a_kh)
    return jnp.stack(mats)


def _bn_scale_shift(ps, pss, gamma, beta, count, W):
    # Finalize batch statistics from per-image partial sums (tiny reduction),
    # fold gamma/beta into a per-lane affine (scale, shift), tiled over W.
    Co = gamma.shape[0]
    mean = ps.reshape(-1, W, Co).sum(axis=(0, 1)) / count
    ex2 = pss.reshape(-1, W, Co).sum(axis=(0, 1)) / count
    var = jnp.maximum(ex2 - mean * mean, 0.0)
    scale = gamma * jax.lax.rsqrt(var + _BN_EPS)
    shift = beta - mean * scale
    return (jnp.tile(scale, W).reshape(1, W * Co).astype(jnp.float32),
            jnp.tile(shift, W).reshape(1, W * Co).astype(jnp.float32))


# ----------------------------------------------------------------------------
# Forward pass
# ----------------------------------------------------------------------------
def unet_up2_forward(x_nchw, skip_nchw, params):
    N, _, H, W = x_nchw.shape
    Co = params["ct_w"].shape[-1]

    # torch.cat((x, skip), dim=1), moved to NHWC and flattened lane-dense.
    x = jnp.transpose(x_nchw, (0, 2, 3, 1))
    sk = jnp.transpose(skip_nchw, (0, 2, 3, 1))
    h = jnp.concatenate([x, sk], axis=-1).astype(jnp.bfloat16).reshape(N, H, -1)

    # --- ConvTranspose2d(in, out, kernel=2, stride=2) ---
    a_ct = _expand_convt_weight(params["ct_w"], W).astype(jnp.bfloat16)
    b_ct = jnp.tile(params["ct_b"], 4 * W).reshape(1, -1).astype(jnp.float32)
    y = convt_matmul(h, a_ct, b_ct)                      # (N, H, 4*W*Co) bf16
    H2, W2 = 2 * H, 2 * W
    act = y.reshape(N, H2, W2 * Co)                      # contiguous (free): pixel shuffle

    # --- 2x ResidualConvBlock(out, out), is_res=False:
    #     four (conv3x3 -> BatchNorm(batch stats) -> GELU) stages; the BN+GELU
    #     of stage k is fused into the conv kernel of stage k+1. ---
    scale = jnp.ones((1, W2 * Co), jnp.float32)
    shift = jnp.zeros((1, W2 * Co), jnp.float32)
    apply_act = False
    for name in ("rb1_c1", "rb1_c2", "rb2_c1", "rb2_c2"):
        p = params[name]
        a = _expand_conv3x3_weight(p["w"], W2).astype(jnp.bfloat16)
        b = jnp.tile(p["b"], W2).reshape(1, -1).astype(jnp.float32)
        act, ps, pss = conv3x3_stats(act, scale, shift, a, b, apply_act=apply_act)
        scale, shift = _bn_scale_shift(ps, pss, p["gamma"], p["beta"],
                                       N * H2 * W2, W2)
        apply_act = True
    # TODO(synk): BatchNorm running-stat (momentum) buffer updates are not
    # reproduced; they do not affect this forward output.

    out = bn_gelu(act, scale, shift)                     # (N, H2, W2*Co) f32
    return jnp.transpose(out.reshape(N, H2, W2, Co), (0, 3, 1, 2))  # NHWC -> NCHW


# ----------------------------------------------------------------------------
# Parameter init (self-initialized; see layout comments for loading torch weights)
# ----------------------------------------------------------------------------
def init_params(key, in_channels, out_channels):
    it = iter(jax.random.split(key, 18))

    def conv_block(cin, cout):
        w = jax.random.normal(next(it), (3, 3, cin, cout), jnp.float32) \
            * (1.0 / jnp.sqrt(9.0 * cin))
        b = 0.05 * jax.random.normal(next(it), (cout,), jnp.float32)
        gamma = 1.0 + 0.1 * jax.random.normal(next(it), (cout,), jnp.float32)
        beta = 0.1 * jax.random.normal(next(it), (cout,), jnp.float32)
        return {"w": w, "b": b, "gamma": gamma, "beta": beta}

    # ConvTranspose2d weight in (Cin, kH, kW, Cout); torch stores (Cin, Cout, kH, kW).
    wt = jax.random.normal(next(it), (in_channels, 2, 2, out_channels), jnp.float32) \
        * (1.0 / jnp.sqrt(float(in_channels)))
    bt = 0.05 * jax.random.normal(next(it), (out_channels,), jnp.float32)
    return {
        "ct_w": wt,
        "ct_b": bt,
        "rb1_c1": conv_block(out_channels, out_channels),
        "rb1_c2": conv_block(out_channels, out_channels),
        "rb2_c1": conv_block(out_channels, out_channels),
        "rb2_c2": conv_block(out_channels, out_channels),
    }


if __name__ == "__main__":
    key = jax.random.PRNGKey(0)
    kx, ksk, kp = jax.random.split(key, 3)

    N, Cx, Cs, H, W = 2, 8, 8, 8, 8
    in_channels = Cx + Cs           # channels after torch.cat((x, skip), dim=1)
    out_channels = 8

    x = jax.random.normal(kx, (N, Cx, H, W), jnp.float32)      # NCHW (PyTorch convention)
    skip = jax.random.normal(ksk, (N, Cs, H, W), jnp.float32)
    params = init_params(kp, in_channels, out_channels)

    fwd = jax.jit(unet_up2_forward)
    out = jax.block_until_ready(fwd(x, skip, params))
    assert out.shape == (N, out_channels, 2 * H, 2 * W), out.shape
    assert bool(jnp.all(jnp.isfinite(out)))
    print("KERNEL_OK")
</pallas_src>

<mosaic_0001>
module attributes {stable_mosaic.version = 11 : i64} {
  func.func @_convt_kernel(%arg0: i32, %arg1: memref<1x8x128xbf16, #tpu.memory_space<vmem>>, %arg2: memref<128x256xbf16, #tpu.memory_space<vmem>>, %arg3: memref<1x256xf32, #tpu.memory_space<vmem>>, %arg4: memref<1x8x256xbf16, #tpu.memory_space<vmem>>) attributes {dimension_semantics = [#tpu.dimension_semantics<parallel>], iteration_bounds = array<i64: 2>, scalar_prefetch = 0 : i64, scratch_operands = 0 : i64, tpu.core_type = #tpu.core_type<tc>, window_params = [{transform_indices = @transform_0, window_bounds = array<i64: 1, 8, 128>}, {pipeline_mode = #tpu.pipeline_mode<synchronous>, transform_indices = @transform_1, window_bounds = array<i64: 128, 256>}, {pipeline_mode = #tpu.pipeline_mode<synchronous>, transform_indices = @transform_2, window_bounds = array<i64: 1, 256>}, {transform_indices = @transform_3, window_bounds = array<i64: 1, 8, 256>}]} {
    %c0 = arith.constant 0 : index
    %c0_0 = arith.constant 0 : index
    %c0_1 = arith.constant 0 : index
    %0 = vector.load %arg1[%c0, %c0_0, %c0_1] : memref<1x8x128xbf16, #tpu.memory_space<vmem>>, vector<1x8x128xbf16>
    %1 = vector.shape_cast %0 : vector<1x8x128xbf16> to vector<8x128xbf16>
    %c0_2 = arith.constant 0 : index
    %c0_3 = arith.constant 0 : index
    %2 = vector.load %arg2[%c0_2, %c0_3] : memref<128x256xbf16, #tpu.memory_space<vmem>>, vector<128x256xbf16>
    %cst = arith.constant dense<0.000000e+00> : vector<8x256xf32>
    %3 = tpu.matmul %1, %2, %cst {dimension_numbers = #tpu.dot_dimension_numbers<[1], [0], [0], [1], [0, 0, 1, 1], [], []>} : vector<8x128xbf16>, vector<128x256xbf16>, vector<8x256xf32> -> vector<8x256xf32>
    %c0_4 = arith.constant 0 : index
    %c0_5 = arith.constant 0 : index
    %4 = vector.load %arg3[%c0_4, %c0_5] : memref<1x256xf32, #tpu.memory_space<vmem>>, vector<1x256xf32>
    %5 = vector.broadcast %4 : vector<1x256xf32> to vector<8x256xf32>
    %6 = arith.addf %3, %5 : vector<8x256xf32>
    %7 = arith.truncf %6 : vector<8x256xf32> to vector<8x256xbf16>
    %c0_6 = arith.constant 0 : index
    %c0_7 = arith.constant 0 : index
    %c0_8 = arith.constant 0 : index
    %8 = vector.load %arg4[%c0_6, %c0_7, %c0_8] : memref<1x8x256xbf16, #tpu.memory_space<vmem>>, vector<1x8x256xbf16>
    %9 = vector.shape_cast %8 : vector<1x8x256xbf16> to vector<8x256xbf16>
    %10 = vector.shape_cast %7 : vector<8x256xbf16> to vector<1x8x256xbf16>
    tpu.vector_store %arg4[%c0_6, %c0_7, %c0_8], %10 {strides = array<i32>} : memref<1x8x256xbf16, #tpu.memory_space<vmem>>, vector<1x8x256xbf16>,
    return
  }
  func.func @transform_0(%arg0: i32) -> (i32, i32, i32) {
    %c0_i32 = arith.constant 0 : i32
    %c0_i32_0 = arith.constant 0 : i32
    %c0_i32_1 = arith.constant 0 : i32
    return %arg0, %c0_i32, %c0_i32_0 : i32, i32, i32
  }
  func.func @transform_1(%arg0: i32) -> (i32, i32) {
    %c0_i32 = arith.constant 0 : i32
    %c0_i32_0 = arith.constant 0 : i32
    %c0_i32_1 = arith.constant 0 : i32
    return %c0_i32, %c0_i32_0 : i32, i32
  }
  func.func @transform_2(%arg0: i32) -> (i32, i32) {
    %c0_i32 = arith.constant 0 : i32
    %c0_i32_0 = arith.constant 0 : i32
    %c0_i32_1 = arith.constant 0 : i32
    return %c0_i32, %c0_i32_0 : i32, i32
  }
  func.func @transform_3(%arg0: i32) -> (i32, i32, i32) {
    %c0_i32 = arith.constant 0 : i32
    %c0_i32_0 = arith.constant 0 : i32
    %c0_i32_1 = arith.constant 0 : i32
    return %arg0, %c0_i32, %c0_i32_0 : i32, i32, i32
  }
}

module attributes {stable_mosaic.version = 11 : i64} {
  func.func @_conv3x3_kernel(%arg0: i32, %arg1: memref<1x16x128xbf16, #tpu.memory_space<vmem>>, %arg2: memref<1x128xf32, #tpu.memory_space<vmem>>, %arg3: memref<1x128xf32, #tpu.memory_space<vmem>>, %arg4: memref<3x128x128xbf16, #tpu.memory_space<vmem>>, %arg5: memref<1x128xf32, #tpu.memory_space<vmem>>, %arg6: memref<1x16x128xbf16, #tpu.memory_space<vmem>>, %arg7: memref<1x1x128xf32, #tpu.memory_space<vmem>>, %arg8: memref<1x1x128xf32, #tpu.memory_space<vmem>>) attributes {dimension_semantics = [#tpu.dimension_semantics<parallel>], iteration_bounds = array<i64: 2>, scalar_prefetch = 0 : i64, scratch_operands = 0 : i64, tpu.core_type = #tpu.core_type<tc>, window_params = [{transform_indices = @transform_0, window_bounds = array<i64: 1, 16, 128>}, {pipeline_mode = #tpu.pipeline_mode<synchronous>, transform_indices = @transform_1, window_bounds = array<i64: 1, 128>}, {pipeline_mode = #tpu.pipeline_mode<synchronous>, transform_indices = @transform_2, window_bounds = array<i64: 1, 128>}, {pipeline_mode = #tpu.pipeline_mode<synchronous>, transform_indices = @transform_3, window_bounds = array<i64: 3, 128, 128>}, {pipeline_mode = #tpu.pipeline_mode<synchronous>, transform_indices = @transform_4, window_bounds = array<i64: 1, 128>}, {transform_indices = @transform_5, window_bounds = array<i64: 1, 16, 128>}, {transform_indices = @transform_6, window_bounds = array<i64: 1, 1, 128>}, {transform_indices = @transform_7, window_bounds = array<i64: 1, 1, 128>}]} {
    %c0 = arith.constant 0 : index
    %c0_0 = arith.constant 0 : index
    %c0_1 = arith.constant 0 : index
    %0 = vector.load %arg1[%c0, %c0_0, %c0_1] : memref<1x16x128xbf16, #tpu.memory_space<vmem>>, vector<1x16x128xbf16>
    %1 = vector.shape_cast %0 : vector<1x16x128xbf16> to vector<16x128xbf16>
    %2 = arith.extf %1 : vector<16x128xbf16> to vector<16x128xf32>
    %3 = arith.truncf %2 : vector<16x128xf32> to vector<16x128xbf16>
    %c0_2 = arith.constant 0 : index
    %c0_3 = arith.constant 0 : index
    %c0_4 = arith.constant 0 : index
    %4 = vector.load %arg4[%c0_2, %c0_3, %c0_4] : memref<3x128x128xbf16, #tpu.memory_space<vmem>>, vector<1x128x128xbf16>
    %5 = vector.shape_cast %4 : vector<1x128x128xbf16> to vector<128x128xbf16>
    %cst = arith.constant dense<0.000000e+00> : vector<16x128xf32>
    %6 = tpu.matmul %3, %5, %cst {dimension_numbers = #tpu.dot_dimension_numbers<[1], [0], [0], [1], [0, 0, 1, 1], [], []>} : vector<16x128xbf16>, vector<128x128xbf16>, vector<16x128xf32> -> vector<16x128xf32>
    %c1 = arith.constant 1 : index
    %c0_5 = arith.constant 0 : index
    %c0_6 = arith.constant 0 : index
    %7 = vector.load %arg4[%c1, %c0_5, %c0_6] : memref<3x128x128xbf16, #tpu.memory_space<vmem>>, vector<1x128x128xbf16>
    %8 = vector.shape_cast %7 : vector<1x128x128xbf16> to vector<128x128xbf16>
    %cst_7 = arith.constant dense<0.000000e+00> : vector<16x128xf32>
    %9 = tpu.matmul %3, %8, %cst_7 {dimension_numbers = #tpu.dot_dimension_numbers<[1], [0], [0], [1], [0, 0, 1, 1], [], []>} : vector<16x128xbf16>, vector<128x128xbf16>, vector<16x128xf32> -> vector<16x128xf32>
    %c2 = arith.constant 2 : index
    %c0_8 = arith.constant 0 : index
    %c0_9 = arith.constant 0 : index
    %10 = vector.load %arg4[%c2, %c0_8, %c0_9] : memref<3x128x128xbf16, #tpu.memory_space<vmem>>, vector<1x128x128xbf16>
    %11 = vector.shape_cast %10 : vector<1x128x128xbf16> to vector<128x128xbf16>
    %cst_10 = arith.constant dense<0.000000e+00> : vector<16x128xf32>
    %12 = tpu.matmul %3, %11, %cst_10 {dimension_numbers = #tpu.dot_dimension_numbers<[1], [0], [0], [1], [0, 0, 1, 1], [], []>} : vector<16x128xbf16>, vector<128x128xbf16>, vector<16x128xf32> -> vector<16x128xf32>
    %13 = tpu.iota {dimensions = array<i32: 0>} : vector<16x16xi32>
    %14 = tpu.iota {dimensions = array<i32: 1>} : vector<16x16xi32>
    %c1_i32 = arith.constant 1 : i32
    %15 = vector.broadcast %c1_i32 : i32 to vector<16x16xi32>
    %16 = arith.addi %14, %15 : vector<16x16xi32>
    %17 = arith.cmpi eq, %13, %16 : vector<16x16xi32>
    %18 = arith.extui %17 : vector<16x16xi1> to vector<16x16xi32>
    %19 = arith.sitofp %18 : vector<16x16xi32> to vector<16x16xf32>
    %c1_i32_11 = arith.constant 1 : i32
    %20 = vector.broadcast %c1_i32_11 : i32 to vector<16x16xi32>
    %21 = arith.addi %13, %20 : vector<16x16xi32>
    %22 = arith.cmpi eq, %14, %21 : vector<16x16xi32>
    %23 = arith.extui %22 : vector<16x16xi1> to vector<16x16xi32>
    %24 = arith.sitofp %23 : vector<16x16xi32> to vector<16x16xf32>
    %c0_12 = arith.constant 0 : index
    %c0_13 = arith.constant 0 : index
    %25 = vector.load %arg5[%c0_12, %c0_13] : memref<1x128xf32, #tpu.memory_space<vmem>>, vector<1x128xf32>
    %26 = vector.broadcast %25 : vector<1x128xf32> to vector<16x128xf32>
    %27 = arith.addf %9, %26 : vector<16x128xf32>
    %cst_14 = arith.constant dense<0.000000e+00> : vector<16x128xf32>
    %28 = tpu.matmul %19, %6, %cst_14 {dimension_numbers = #tpu.dot_dimension_numbers<[1], [0], [0], [1], [0, 0, 1, 1], [], []>} : vector<16x16xf32>, vector<16x128xf32>, vector<16x128xf32> -> vector<16x128xf32>
    %29 = arith.addf %27, %28 : vector<16x128xf32>
    %cst_15 = arith.constant dense<0.000000e+00> : vector<16x128xf32>
    %30 = tpu.matmul %24, %12, %cst_15 {dimension_numbers = #tpu.dot_dimension_numbers<[1], [0], [0], [1], [0, 0, 1, 1], [], []>} : vector<16x16xf32>, vector<16x128xf32>, vector<16x128xf32> -> vector<16x128xf32>
    %31 = arith.addf %29, %30 : vector<16x128xf32>
    %32 = arith.truncf %31 : vector<16x128xf32> to vector<16x128xbf16>
    %c0_16 = arith.constant 0 : index
    %c0_17 = arith.constant 0 : index
    %c0_18 = arith.constant 0 : index
    %33 = vector.load %arg6[%c0_16, %c0_17, %c0_18] : memref<1x16x128xbf16, #tpu.memory_space<vmem>>, vector<1x16x128xbf16>
    %34 = vector.shape_cast %33 : vector<1x16x128xbf16> to vector<16x128xbf16>
    %35 = vector.shape_cast %32 : vector<16x128xbf16> to vector<1x16x128xbf16>
    tpu.vector_store %arg6[%c0_16, %c0_17, %c0_18], %35 {strides = array<i32>} : memref<1x16x128xbf16, #tpu.memory_space<vmem>>, vector<1x16x128xbf16>,
    %cst_19 = arith.constant dense<0.000000e+00> : vector<128xf32>
    %36 = vector.multi_reduction <add>, %31, %cst_19 [0] : vector<16x128xf32> to vector<128xf32>
    %37 = vector.shape_cast %36 : vector<128xf32> to vector<1x128xf32>
    %c0_20 = arith.constant 0 : index
    %c0_21 = arith.constant 0 : index
    %c0_22 = arith.constant 0 : index
    %38 = vector.load %arg7[%c0_20, %c0_21, %c0_22] : memref<1x1x128xf32, #tpu.memory_space<vmem>>, vector<1x1x128xf32>
    %39 = vector.shape_cast %38 : vector<1x1x128xf32> to vector<1x128xf32>
    %40 = vector.shape_cast %37 : vector<1x128xf32> to vector<1x1x128xf32>
    tpu.vector_store %arg7[%c0_20, %c0_21, %c0_22], %40 {strides = array<i32>} : memref<1x1x128xf32, #tpu.memory_space<vmem>>, vector<1x1x128xf32>,
    %41 = arith.mulf %31, %31 : vector<16x128xf32>
    %cst_23 = arith.constant dense<0.000000e+00> : vector<128xf32>
    %42 = vector.multi_reduction <add>, %41, %cst_23 [0] : vector<16x128xf32> to vector<128xf32>
    %43 = vector.shape_cast %42 : vector<128xf32> to vector<1x128xf32>
    %c0_24 = arith.constant 0 : index
    %c0_25 = arith.constant 0 : index
    %c0_26 = arith.constant 0 : index
    %44 = vector.load %arg8[%c0_24, %c0_25, %c0_26] : memref<1x1x128xf32, #tpu.memory_space<vmem>>, vector<1x1x128xf32>
    %45 = vector.shape_cast %44 : vector<1x1x128xf32> to vector<1x128xf32>
    %46 = vector.shape_cast %43 : vector<1x128xf32> to vector<1x1x128xf32>
    tpu.vector_store %arg8[%c0_24, %c0_25, %c0_26], %46 {strides = array<i32>} : memref<1x1x128xf32, #tpu.memory_space<vmem>>, vector<1x1x128xf32>,
    return
  }
  func.func @transform_0(%arg0: i32) -> (i32, i32, i32) {
    %c0_i32 = arith.constant 0 : i32
    %c0_i32_0 = arith.constant 0 : i32
    %c0_i32_1 = arith.constant 0 : i32
    return %arg0, %c0_i32, %c0_i32_0 : i32, i32, i32
  }
  func.func @transform_1(%arg0: i32) -> (i32, i32) {
    %c0_i32 = arith.constant 0 : i32
    %c0_i32_0 = arith.constant 0 : i32
    %c0_i32_1 = arith.constant 0 : i32
    return %c0_i32, %c0_i32_0 : i32, i32
  }
  func.func @transform_2(%arg0: i32) -> (i32, i32) {
    %c0_i32 = arith.constant 0 : i32
    %c0_i32_0 = arith.constant 0 : i32
    %c0_i32_1 = arith.constant 0 : i32
    return %c0_i32, %c0_i32_0 : i32, i32
  }
  func.func @transform_3(%arg0: i32) -> (i32, i32, i32) {
    %c0_i32 = arith.constant 0 : i32
    %c0_i32_0 = arith.constant 0 : i32
    %c0_i32_1 = arith.constant 0 : i32
    %c0_i32_2 = arith.constant 0 : i32
    return %c0_i32, %c0_i32_0, %c0_i32_1 : i32, i32, i32
  }
  func.func @transform_4(%arg0: i32) -> (i32, i32) {
    %c0_i32 = arith.constant 0 : i32
    %c0_i32_0 = arith.constant 0 : i32
    %c0_i32_1 = arith.constant 0 : i32
    return %c0_i32, %c0_i32_0 : i32, i32
  }
  func.func @transform_5(%arg0: i32) -> (i32, i32, i32) {
    %c0_i32 = arith.constant 0 : i32
    %c0_i32_0 = arith.constant 0 : i32
    %c0_i32_1 = arith.constant 0 : i32
    return %arg0, %c0_i32, %c0_i32_0 : i32, i32, i32
  }
  func.func @transform_6(%arg0: i32) -> (i32, i32, i32) {
    %c0_i32 = arith.constant 0 : i32
    %c0_i32_0 = arith.constant 0 : i32
    %c0_i32_1 = arith.constant 0 : i32
    return %arg0, %c0_i32, %c0_i32_0 : i32, i32, i32
  }
  func.func @transform_7(%arg0: i32) -> (i32, i32, i32) {
    %c0_i32 = arith.constant 0 : i32
    %c0_i32_0 = arith.constant 0 : i32
    %c0_i32_1 = arith.constant 0 : i32
    return %arg0, %c0_i32, %c0_i32_0 : i32, i32, i32
  }
}

module attributes {stable_mosaic.version = 11 : i64} {
  func.func @_conv3x3_kernel(%arg0: i32, %arg1: memref<1x16x128xbf16, #tpu.memory_space<vmem>>, %arg2: memref<1x128xf32, #tpu.memory_space<vmem>>, %arg3: memref<1x128xf32, #tpu.memory_space<vmem>>, %arg4: memref<3x128x128xbf16, #tpu.memory_space<vmem>>, %arg5: memref<1x128xf32, #tpu.memory_space<vmem>>, %arg6: memref<1x16x128xbf16, #tpu.memory_space<vmem>>, %arg7: memref<1x1x128xf32, #tpu.memory_space<vmem>>, %arg8: memref<1x1x128xf32, #tpu.memory_space<vmem>>) attributes {dimension_semantics = [#tpu.dimension_semantics<parallel>], iteration_bounds = array<i64: 2>, scalar_prefetch = 0 : i64, scratch_operands = 0 : i64, tpu.core_type = #tpu.core_type<tc>, window_params = [{transform_indices = @transform_0, window_bounds = array<i64: 1, 16, 128>}, {pipeline_mode = #tpu.pipeline_mode<synchronous>, transform_indices = @transform_1, window_bounds = array<i64: 1, 128>}, {pipeline_mode = #tpu.pipeline_mode<synchronous>, transform_indices = @transform_2, window_bounds = array<i64: 1, 128>}, {pipeline_mode = #tpu.pipeline_mode<synchronous>, transform_indices = @transform_3, window_bounds = array<i64: 3, 128, 128>}, {pipeline_mode = #tpu.pipeline_mode<synchronous>, transform_indices = @transform_4, window_bounds = array<i64: 1, 128>}, {transform_indices = @transform_5, window_bounds = array<i64: 1, 16, 128>}, {transform_indices = @transform_6, window_bounds = array<i64: 1, 1, 128>}, {transform_indices = @transform_7, window_bounds = array<i64: 1, 1, 128>}]} {
    %c0 = arith.constant 0 : index
    %c0_0 = arith.constant 0 : index
    %c0_1 = arith.constant 0 : index
    %0 = vector.load %arg1[%c0, %c0_0, %c0_1] : memref<1x16x128xbf16, #tpu.memory_space<vmem>>, vector<1x16x128xbf16>
    %1 = vector.shape_cast %0 : vector<1x16x128xbf16> to vector<16x128xbf16>
    %2 = arith.extf %1 : vector<16x128xbf16> to vector<16x128xf32>
    %c0_2 = arith.constant 0 : index
    %c0_3 = arith.constant 0 : index
    %3 = vector.load %arg2[%c0_2, %c0_3] : memref<1x128xf32, #tpu.memory_space<vmem>>, vector<1x128xf32>
    %4 = vector.broadcast %3 : vector<1x128xf32> to vector<16x128xf32>
    %5 = arith.mulf %2, %4 : vector<16x128xf32>
    %c0_4 = arith.constant 0 : index
    %c0_5 = arith.constant 0 : index
    %6 = vector.load %arg3[%c0_4, %c0_5] : memref<1x128xf32, #tpu.memory_space<vmem>>, vector<1x128xf32>
    %7 = vector.broadcast %6 : vector<1x128xf32> to vector<16x128xf32>
    %8 = arith.addf %5, %7 : vector<16x128xf32>
    %cst = arith.constant 5.000000e-01 : f32
    %9 = vector.broadcast %cst : f32 to vector<16x128xf32>
    %10 = arith.mulf %9, %8 : vector<16x128xf32>
    %cst_6 = arith.constant 0.707106769 : f32
    %11 = vector.broadcast %cst_6 : f32 to vector<16x128xf32>
    %12 = arith.mulf %8, %11 : vector<16x128xf32>
    %cst_7 = arith.constant 0.000000e+00 : f32
    %13 = vector.broadcast %cst_7 : f32 to vector<16x128xf32>
    %14 = arith.cmpf oge, %12, %13 : vector<16x128xf32>
    %cst_8 = arith.constant 1.000000e+00 : f32
    %cst_9 = arith.constant -1.000000e+00 : f32
    %15 = vector.broadcast %cst_8 : f32 to vector<16x128xf32>
    %16 = vector.broadcast %cst_9 : f32 to vector<16x128xf32>
    %17 = arith.select %14, %15, %16 : vector<16x128xi1>, vector<16x128xf32>
    %18 = math.absf %12 : vector<16x128xf32>
    %cst_10 = arith.constant 0.327591091 : f32
    %19 = vector.broadcast %cst_10 : f32 to vector<16x128xf32>
    %20 = arith.mulf %19, %18 : vector<16x128xf32>
    %cst_11 = arith.constant 1.000000e+00 : f32
    %21 = vector.broadcast %cst_11 : f32 to vector<16x128xf32>
    %22 = arith.addf %21, %20 : vector<16x128xf32>
    %cst_12 = arith.constant 1.000000e+00 : f32
    %23 = vector.broadcast %cst_12 : f32 to vector<16x128xf32>
    %24 = arith.divf %23, %22 : vector<16x128xf32>
    %cst_13 = arith.constant 1.06140542 : f32
    %25 = vector.broadcast %cst_13 : f32 to vector<16x128xf32>
    %26 = arith.mulf %25, %24 : vector<16x128xf32>
    %cst_14 = arith.constant -1.45315206 : f32
    %27 = vector.broadcast %cst_14 : f32 to vector<16x128xf32>
    %28 = arith.addf %26, %27 : vector<16x128xf32>
    %29 = arith.mulf %28, %24 : vector<16x128xf32>
    %cst_15 = arith.constant 1.42141378 : f32
    %30 = vector.broadcast %cst_15 : f32 to vector<16x128xf32>
    %31 = arith.addf %29, %30 : vector<16x128xf32>
    %32 = arith.mulf %31, %24 : vector<16x128xf32>
    %cst_16 = arith.constant -0.284496725 : f32
    %33 = vector.broadcast %cst_16 : f32 to vector<16x128xf32>
    %34 = arith.addf %32, %33 : vector<16x128xf32>
    %35 = arith.mulf %34, %24 : vector<16x128xf32>
    %cst_17 = arith.constant 0.254829586 : f32
    %36 = vector.broadcast %cst_17 : f32 to vector<16x128xf32>
    %37 = arith.addf %35, %36 : vector<16x128xf32>
    %38 = arith.mulf %37, %24 : vector<16x128xf32>
    %cst_18 = arith.constant 0.000000e+00 : f32
    %39 = vector.broadcast %cst_18 : f32 to vector<16x128xf32>
    %40 = arith.subf %39, %18 : vector<16x128xf32>
    %41 = arith.mulf %40, %18 : vector<16x128xf32>
    %42 = math.exp %41 : vector<16x128xf32>
    %43 = arith.mulf %38, %42 : vector<16x128xf32>
    %cst_19 = arith.constant 1.000000e+00 : f32
    %44 = vector.broadcast %cst_19 : f32 to vector<16x128xf32>
    %45 = arith.subf %44, %43 : vector<16x128xf32>
    %46 = arith.mulf %17, %45 : vector<16x128xf32>
    %cst_20 = arith.constant 1.000000e+00 : f32
    %47 = vector.broadcast %cst_20 : f32 to vector<16x128xf32>
    %48 = arith.addf %47, %46 : vector<16x128xf32>
    %49 = arith.mulf %10, %48 : vector<16x128xf32>
    %50 = arith.truncf %49 : vector<16x128xf32> to vector<16x128xbf16>
    %c0_21 = arith.constant 0 : index
    %c0_22 = arith.constant 0 : index
    %c0_23 = arith.constant 0 : index
    %51 = vector.load %arg4[%c0_21, %c0_22, %c0_23] : memref<3x128x128xbf16, #tpu.memory_space<vmem>>, vector<1x128x128xbf16>
    %52 = vector.shape_cast %51 : vector<1x128x128xbf16> to vector<128x128xbf16>
    %cst_24 = arith.constant dense<0.000000e+00> : vector<16x128xf32>
    %53 = tpu.matmul %50, %52, %cst_24 {dimension_numbers = #tpu.dot_dimension_numbers<[1], [0], [0], [1], [0, 0, 1, 1], [], []>} : vector<16x128xbf16>, vector<128x128xbf16>, vector<16x128xf32> -> vector<16x128xf32>
    %c1 = arith.constant 1 : index
    %c0_25 = arith.constant 0 : index
    %c0_26 = arith.constant 0 : index
    %54 = vector.load %arg4[%c1, %c0_25, %c0_26] : memref<3x128x128xbf16, #tpu.memory_space<vmem>>, vector<1x128x128xbf16>
    %55 = vector.shape_cast %54 : vector<1x128x128xbf16> to vector<128x128xbf16>
    %cst_27 = arith.constant dense<0.000000e+00> : vector<16x128xf32>
    %56 = tpu.matmul %50, %55, %cst_27 {dimension_numbers = #tpu.dot_dimension_numbers<[1], [0], [0], [1], [0, 0, 1, 1], [], []>} : vector<16x128xbf16>, vector<128x128xbf16>, vector<16x128xf32> -> vector<16x128xf32>
    %c2 = arith.constant 2 : index
    %c0_28 = arith.constant 0 : index
    %c0_29 = arith.constant 0 : index
    %57 = vector.load %arg4[%c2, %c0_28, %c0_29] : memref<3x128x128xbf16, #tpu.memory_space<vmem>>, vector<1x128x128xbf16>
    %58 = vector.shape_cast %57 : vector<1x128x128xbf16> to vector<128x128xbf16>
    %cst_30 = arith.constant dense<0.000000e+00> : vector<16x128xf32>
    %59 = tpu.matmul %50, %58, %cst_30 {dimension_numbers = #tpu.dot_dimension_numbers<[1], [0], [0], [1], [0, 0, 1, 1], [], []>} : vector<16x128xbf16>, vector<128x128xbf16>, vector<16x128xf32> -> vector<16x128xf32>
    %60 = tpu.iota {dimensions = array<i32: 0>} : vector<16x16xi32>
    %61 = tpu.iota {dimensions = array<i32: 1>} : vector<16x16xi32>
    %c1_i32 = arith.constant 1 : i32
    %62 = vector.broadcast %c1_i32 : i32 to vector<16x16xi32>
    %63 = arith.addi %61, %62 : vector<16x16xi32>
    %64 = arith.cmpi eq, %60, %63 : vector<16x16xi32>
    %65 = arith.extui %64 : vector<16x16xi1> to vector<16x16xi32>
    %66 = arith.sitofp %65 : vector<16x16xi32> to vector<16x16xf32>
    %c1_i32_31 = arith.constant 1 : i32
    %67 = vector.broadcast %c1_i32_31 : i32 to vector<16x16xi32>
    %68 = arith.addi %60, %67 : vector<16x16xi32>
    %69 = arith.cmpi eq, %61, %68 : vector<16x16xi32>
    %70 = arith.extui %69 : vector<16x16xi1> to vector<16x16xi32>
    %71 = arith.sitofp %70 : vector<16x16xi32> to vector<16x16xf32>
    %c0_32 = arith.constant 0 : index
    %c0_33 = arith.constant 0 : index
    %72 = vector.load %arg5[%c0_32, %c0_33] : memref<1x128xf32, #tpu.memory_space<vmem>>, vector<1x128xf32>
    %73 = vector.broadcast %72 : vector<1x128xf32> to vector<16x128xf32>
    %74 = arith.addf %56, %73 : vector<16x128xf32>
    %cst_34 = arith.constant dense<0.000000e+00> : vector<16x128xf32>
    %75 = tpu.matmul %66, %53, %cst_34 {dimension_numbers = #tpu.dot_dimension_numbers<[1], [0], [0], [1], [0, 0, 1, 1], [], []>} : vector<16x16xf32>, vector<16x128xf32>, vector<16x128xf32> -> vector<16x128xf32>
    %76 = arith.addf %74, %75 : vector<16x128xf32>
    %cst_35 = arith.constant dense<0.000000e+00> : vector<16x128xf32>
    %77 = tpu.matmul %71, %59, %cst_35 {dimension_numbers = #tpu.dot_dimension_numbers<[1], [0], [0], [1], [0, 0, 1, 1], [], []>} : vector<16x16xf32>, vector<16x128xf32>, vector<16x128xf32> -> vector<16x128xf32>
    %78 = arith.addf %76, %77 : vector<16x128xf32>
    %79 = arith.truncf %78 : vector<16x128xf32> to vector<16x128xbf16>
    %c0_36 = arith.constant 0 : index
    %c0_37 = arith.constant 0 : index
    %c0_38 = arith.constant 0 : index
    %80 = vector.load %arg6[%c0_36, %c0_37, %c0_38] : memref<1x16x128xbf16, #tpu.memory_space<vmem>>, vector<1x16x128xbf16>
    %81 = vector.shape_cast %80 : vector<1x16x128xbf16> to vector<16x128xbf16>
    %82 = vector.shape_cast %79 : vector<16x128xbf16> to vector<1x16x128xbf16>
    tpu.vector_store %arg6[%c0_36, %c0_37, %c0_38], %82 {strides = array<i32>} : memref<1x16x128xbf16, #tpu.memory_space<vmem>>, vector<1x16x128xbf16>,
    %cst_39 = arith.constant dense<0.000000e+00> : vector<128xf32>
    %83 = vector.multi_reduction <add>, %78, %cst_39 [0] : vector<16x128xf32> to vector<128xf32>
    %84 = vector.shape_cast %83 : vector<128xf32> to vector<1x128xf32>
    %c0_40 = arith.constant 0 : index
    %c0_41 = arith.constant 0 : index
    %c0_42 = arith.constant 0 : index
    %85 = vector.load %arg7[%c0_40, %c0_41, %c0_42] : memref<1x1x128xf32, #tpu.memory_space<vmem>>, vector<1x1x128xf32>
    %86 = vector.shape_cast %85 : vector<1x1x128xf32> to vector<1x128xf32>
    %87 = vector.shape_cast %84 : vector<1x128xf32> to vector<1x1x128xf32>
    tpu.vector_store %arg7[%c0_40, %c0_41, %c0_42], %87 {strides = array<i32>} : memref<1x1x128xf32, #tpu.memory_space<vmem>>, vector<1x1x128xf32>,
    %88 = arith.mulf %78, %78 : vector<16x128xf32>
    %cst_43 = arith.constant dense<0.000000e+00> : vector<128xf32>
    %89 = vector.multi_reduction <add>, %88, %cst_43 [0] : vector<16x128xf32> to vector<128xf32>
    %90 = vector.shape_cast %89 : vector<128xf32> to vector<1x128xf32>
    %c0_44 = arith.constant 0 : index
    %c0_45 = arith.constant 0 : index
    %c0_46 = arith.constant 0 : index
    %91 = vector.load %arg8[%c0_44, %c0_45, %c0_46] : memref<1x1x128xf32, #tpu.memory_space<vmem>>, vector<1x1x128xf32>
    %92 = vector.shape_cast %91 : vector<1x1x128xf32> to vector<1x128xf32>
    %93 = vector.shape_cast %90 : vector<1x128xf32> to vector<1x1x128xf32>
    tpu.vector_store %arg8[%c0_44, %c0_45, %c0_46], %93 {strides = array<i32>} : memref<1x1x128xf32, #tpu.memory_space<vmem>>, vector<1x1x128xf32>,
    return
  }
  func.func @transform_0(%arg0: i32) -> (i32, i32, i32) {
    %c0_i32 = arith.constant 0 : i32
    %c0_i32_0 = arith.constant 0 : i32
    %c0_i32_1 = arith.constant 0 : i32
    return %arg0, %c0_i32, %c0_i32_0 : i32, i32, i32
  }
  func.func @transform_1(%arg0: i32) -> (i32, i32) {
    %c0_i32 = arith.constant 0 : i32
    %c0_i32_0 = arith.constant 0 : i32
    %c0_i32_1 = arith.constant 0 : i32
    return %c0_i32, %c0_i32_0 : i32, i32
  }
  func.func @transform_2(%arg0: i32) -> (i32, i32) {
    %c0_i32 = arith.constant 0 : i32
    %c0_i32_0 = arith.constant 0 : i32
    %c0_i32_1 = arith.constant 0 : i32
    return %c0_i32, %c0_i32_0 : i32, i32
  }
  func.func @transform_3(%arg0: i32) -> (i32, i32, i32) {
    %c0_i32 = arith.constant 0 : i32
    %c0_i32_0 = arith.constant 0 : i32
    %c0_i32_1 = arith.constant 0 : i32
    %c0_i32_2 = arith.constant 0 : i32
    return %c0_i32, %c0_i32_0, %c0_i32_1 : i32, i32, i32
  }
  func.func @transform_4(%arg0: i32) -> (i32, i32) {
    %c0_i32 = arith.constant 0 : i32
    %c0_i32_0 = arith.constant 0 : i32
    %c0_i32_1 = arith.constant 0 : i32
    return %c0_i32, %c0_i32_0 : i32, i32
  }
  func.func @transform_5(%arg0: i32) -> (i32, i32, i32) {
    %c0_i32 = arith.constant 0 : i32
    %c0_i32_0 = arith.constant 0 : i32
    %c0_i32_1 = arith.constant 0 : i32
    return %arg0, %c0_i32, %c0_i32_0 : i32, i32, i32
  }
  func.func @transform_6(%arg0: i32) -> (i32, i32, i32) {
    %c0_i32 = arith.constant 0 : i32
    %c0_i32_0 = arith.constant 0 : i32
    %c0_i32_1 = arith.constant 0 : i32
    return %arg0, %c0_i32, %c0_i32_0 : i32, i32, i32
  }
  func.func @transform_7(%arg0: i32) -> (i32, i32, i32) {
    %c0_i32 = arith.constant 0 : i32
    %c0_i32_0 = arith.constant 0 : i32
    %c0_i32_1 = arith.constant 0 : i32
    return %arg0, %c0_i32, %c0_i32_0 : i32, i32, i32
  }
}

module attributes {stable_mosaic.version = 11 : i64} {
  func.func @_bn_gelu_kernel(%arg0: i32, %arg1: memref<1x16x128xbf16, #tpu.memory_space<vmem>>, %arg2: memref<1x128xf32, #tpu.memory_space<vmem>>, %arg3: memref<1x128xf32, #tpu.memory_space<vmem>>, %arg4: memref<1x16x128xf32, #tpu.memory_space<vmem>>) attributes {dimension_semantics = [#tpu.dimension_semantics<parallel>], iteration_bounds = array<i64: 2>, scalar_prefetch = 0 : i64, scratch_operands = 0 : i64, tpu.core_type = #tpu.core_type<tc>, window_params = [{transform_indices = @transform_0, window_bounds = array<i64: 1, 16, 128>}, {pipeline_mode = #tpu.pipeline_mode<synchronous>, transform_indices = @transform_1, window_bounds = array<i64: 1, 128>}, {pipeline_mode = #tpu.pipeline_mode<synchronous>, transform_indices = @transform_2, window_bounds = array<i64: 1, 128>}, {transform_indices = @transform_3, window_bounds = array<i64: 1, 16, 128>}]} {
    %c0 = arith.constant 0 : index
    %c0_0 = arith.constant 0 : index
    %c0_1 = arith.constant 0 : index
    %0 = vector.load %arg1[%c0, %c0_0, %c0_1] : memref<1x16x128xbf16, #tpu.memory_space<vmem>>, vector<1x16x128xbf16>
    %1 = vector.shape_cast %0 : vector<1x16x128xbf16> to vector<16x128xbf16>
    %2 = arith.extf %1 : vector<16x128xbf16> to vector<16x128xf32>
    %c0_2 = arith.constant 0 : index
    %c0_3 = arith.constant 0 : index
    %3 = vector.load %arg2[%c0_2, %c0_3] : memref<1x128xf32, #tpu.memory_space<vmem>>, vector<1x128xf32>
    %4 = vector.broadcast %3 : vector<1x128xf32> to vector<16x128xf32>
    %5 = arith.mulf %2, %4 : vector<16x128xf32>
    %c0_4 = arith.constant 0 : index
    %c0_5 = arith.constant 0 : index
    %6 = vector.load %arg3[%c0_4, %c0_5] : memref<1x128xf32, #tpu.memory_space<vmem>>, vector<1x128xf32>
    %7 = vector.broadcast %6 : vector<1x128xf32> to vector<16x128xf32>
    %8 = arith.addf %5, %7 : vector<16x128xf32>
    %cst = arith.constant 5.000000e-01 : f32
    %9 = vector.broadcast %cst : f32 to vector<16x128xf32>
    %10 = arith.mulf %9, %8 : vector<16x128xf32>
    %cst_6 = arith.constant 0.707106769 : f32
    %11 = vector.broadcast %cst_6 : f32 to vector<16x128xf32>
    %12 = arith.mulf %8, %11 : vector<16x128xf32>
    %cst_7 = arith.constant 0.000000e+00 : f32
    %13 = vector.broadcast %cst_7 : f32 to vector<16x128xf32>
    %14 = arith.cmpf oge, %12, %13 : vector<16x128xf32>
    %cst_8 = arith.constant 1.000000e+00 : f32
    %cst_9 = arith.constant -1.000000e+00 : f32
    %15 = vector.broadcast %cst_8 : f32 to vector<16x128xf32>
    %16 = vector.broadcast %cst_9 : f32 to vector<16x128xf32>
    %17 = arith.select %14, %15, %16 : vector<16x128xi1>, vector<16x128xf32>
    %18 = math.absf %12 : vector<16x128xf32>
    %cst_10 = arith.constant 0.327591091 : f32
    %19 = vector.broadcast %cst_10 : f32 to vector<16x128xf32>
    %20 = arith.mulf %19, %18 : vector<16x128xf32>
    %cst_11 = arith.constant 1.000000e+00 : f32
    %21 = vector.broadcast %cst_11 : f32 to vector<16x128xf32>
    %22 = arith.addf %21, %20 : vector<16x128xf32>
    %cst_12 = arith.constant 1.000000e+00 : f32
    %23 = vector.broadcast %cst_12 : f32 to vector<16x128xf32>
    %24 = arith.divf %23, %22 : vector<16x128xf32>
    %cst_13 = arith.constant 1.06140542 : f32
    %25 = vector.broadcast %cst_13 : f32 to vector<16x128xf32>
    %26 = arith.mulf %25, %24 : vector<16x128xf32>
    %cst_14 = arith.constant -1.45315206 : f32
    %27 = vector.broadcast %cst_14 : f32 to vector<16x128xf32>
    %28 = arith.addf %26, %27 : vector<16x128xf32>
    %29 = arith.mulf %28, %24 : vector<16x128xf32>
    %cst_15 = arith.constant 1.42141378 : f32
    %30 = vector.broadcast %cst_15 : f32 to vector<16x128xf32>
    %31 = arith.addf %29, %30 : vector<16x128xf32>
    %32 = arith.mulf %31, %24 : vector<16x128xf32>
    %cst_16 = arith.constant -0.284496725 : f32
    %33 = vector.broadcast %cst_16 : f32 to vector<16x128xf32>
    %34 = arith.addf %32, %33 : vector<16x128xf32>
    %35 = arith.mulf %34, %24 : vector<16x128xf32>
    %cst_17 = arith.constant 0.254829586 : f32
    %36 = vector.broadcast %cst_17 : f32 to vector<16x128xf32>
    %37 = arith.addf %35, %36 : vector<16x128xf32>
    %38 = arith.mulf %37, %24 : vector<16x128xf32>
    %cst_18 = arith.constant 0.000000e+00 : f32
    %39 = vector.broadcast %cst_18 : f32 to vector<16x128xf32>
    %40 = arith.subf %39, %18 : vector<16x128xf32>
    %41 = arith.mulf %40, %18 : vector<16x128xf32>
    %42 = math.exp %41 : vector<16x128xf32>
    %43 = arith.mulf %38, %42 : vector<16x128xf32>
    %cst_19 = arith.constant 1.000000e+00 : f32
    %44 = vector.broadcast %cst_19 : f32 to vector<16x128xf32>
    %45 = arith.subf %44, %43 : vector<16x128xf32>
    %46 = arith.mulf %17, %45 : vector<16x128xf32>
    %cst_20 = arith.constant 1.000000e+00 : f32
    %47 = vector.broadcast %cst_20 : f32 to vector<16x128xf32>
    %48 = arith.addf %47, %46 : vector<16x128xf32>
    %49 = arith.mulf %10, %48 : vector<16x128xf32>
    %c0_21 = arith.constant 0 : index
    %c0_22 = arith.constant 0 : index
    %c0_23 = arith.constant 0 : index
    %50 = vector.load %arg4[%c0_21, %c0_22, %c0_23] : memref<1x16x128xf32, #tpu.memory_space<vmem>>, vector<1x16x128xf32>
    %51 = vector.shape_cast %50 : vector<1x16x128xf32> to vector<16x128xf32>
    %52 = vector.shape_cast %49 : vector<16x128xf32> to vector<1x16x128xf32>
    tpu.vector_store %arg4[%c0_21, %c0_22, %c0_23], %52 {strides = array<i32>} : memref<1x16x128xf32, #tpu.memory_space<vmem>>, vector<1x16x128xf32>,
    return
  }
  func.func @transform_0(%arg0: i32) -> (i32, i32, i32) {
    %c0_i32 = arith.constant 0 : i32
    %c0_i32_0 = arith.constant 0 : i32
    %c0_i32_1 = arith.constant 0 : i32
    return %arg0, %c0_i32, %c0_i32_0 : i32, i32, i32
  }
  func.func @transform_1(%arg0: i32) -> (i32, i32) {
    %c0_i32 = arith.constant 0 : i32
    %c0_i32_0 = arith.constant 0 : i32
    %c0_i32_1 = arith.constant 0 : i32
    return %c0_i32, %c0_i32_0 : i32, i32
  }
  func.func @transform_2(%arg0: i32) -> (i32, i32) {
    %c0_i32 = arith.constant 0 : i32
    %c0_i32_0 = arith.constant 0 : i32
    %c0_i32_1 = arith.constant 0 : i32
    return %c0_i32, %c0_i32_0 : i32, i32
  }
  func.func @transform_3(%arg0: i32) -> (i32, i32, i32) {
    %c0_i32 = arith.constant 0 : i32
    %c0_i32_0 = arith.constant 0 : i32
    %c0_i32_1 = arith.constant 0 : i32
    return %arg0, %c0_i32, %c0_i32_0 : i32, i32, i32
  }
}

</mosaic_0001>

<bundles_post_ra>
// kernel: tile.73
= control target key start
LH: loop header
LB: loop body
LE: loop exit
PB: predicated region body
PF: predicated region fallthrough
CT: control target
= control target key end

     0   :  { %s28_s0 = inlined_call_operand.vmem [shape: f32[8], index: 0, kind: input, shape index: {}]   ;;  %s29_s1 = inlined_call_operand.vmem [shape: f32[16,8], index: 1, kind: output, shape index: {}]  }
   0x1   :  { %v4_v0 = vld [vmem:[%s28_s0] ss:$0 sm:$0xff] }
   0x2   :  { %5 = vst [vmem:[%s29_s1] sm:$0xff] %v4_v0 }
   0x3   :  { %8 = vst [vmem:[%s29_s1 + $0x8] sm:$0xff] %v4_v0 }

// kernel: tile.74
= control target key start
LH: loop header
LB: loop body
LE: loop exit
PB: predicated region body
PF: predicated region fallthrough
CT: control target
= control target key end

     0   :  { %s131_s10 = smov 120   ;;  %s132_s11 = smov 104   ;;  %vm3_vm0 = vcmask 64512   ;;  %vm9_vm1 = vcmask 1048512   ;;  %vm15_vm2 = vcmask 982912   ;;  %vm21_vm3 = vcmask 917312   ;;  %s207_s0 = inlined_call_operand.vmem [shape: f32[16,8], index: 0, kind: input, shape index: {}]   ;;  %s208_s1 = inlined_call_operand.vmem [shape: f32[1,128], index: 1, kind: output, shape index: {}]  }
   0x1   :  { %v101_v0 = vld [vmem:[%s207_s0 + $0xf] sm:$0x1]   ;;  %v103_v1 = vld [vmem:[%s207_s0 + $0xd] sm:$0x1]   ;;  %v105_v2 = vld [vmem:[%s207_s0 + $0xb] sm:$0x1]  }
   0x2   :  { %7 = vrot.lane.b32.xlu0 %v101_v0, %s131_s10  ;;  %19 = vrot.lane.b32.xlu1 %v103_v1, %s132_s11  ;;  %s133_s14 = smov 88   ;;  %v102_v3 = vld [vmem:[%s207_s0 + $0xe] sm:$0x1]   ;;  %v104_v4 = vld [vmem:[%s207_s0 + $0xc] sm:$0x1]   ;;  %s134_s19 = smov 112  }
   0x3   :  { %31 = vrot.lane.b32.xlu2 %v105_v2, %s133_s14  ;;  %s135_s20 = smov 96   ;;  %v106_v5 = vld [vmem:[%s207_s0 + $0xa] sm:$0x1]   ;;  %s136_s23 = smov 80   ;;  %v107_v6 = vld [vmem:[%s207_s0 + $0x9] sm:$0x1]  }
   0x4   :  { %v108_v7 = vld [vmem:[%s207_s0 + $0x8] sm:$0x1]   ;;  %s137_s28 = smov 72   ;;  %s138_s29 = smov 64   ;;  %v109_v8 = vld [vmem:[%s207_s0 + $0x7] sm:$0x1]  }
   0x5   :  { %s139_s3 = smov 56   ;;  %v110_v9 = vld [vmem:[%s207_s0 + $0x6] sm:$0x1]   ;;  %v111_v10 = vld [vmem:[%s207_s0 + $0x5] sm:$0x1]   ;;  %s140_s8 = smov 48  }
   0x6   :  { %s141_s9 = smov 40   ;;  %v112_v11 = vld [vmem:[%s207_s0 + $0x4] sm:$0x1]   ;;  %s142_s12 = smov 32   ;;  %v113_v12 = vld [vmem:[%s207_s0 + $0x3] sm:$0x1]  }
   0x7   :  { %v114_v13 = vld [vmem:[%s207_s0 + $0x2] sm:$0x1]   ;;  %s143_s17 = smov 24   ;;  %s144_s18 = smov 16   ;;  %v115_v14 = vld [vmem:[%s207_s0 + $0x1] sm:$0x1]  }
   0x8   :  { %s145_s21 = smov 8   ;;  %v2_v15 = vld [vmem:[%s207_s0] sm:$0x1]   ;;  %vm27_vm4 = vcmask 851712   ;;  %vm33_vm5 = vcmask 786112   ;;  %vm39_vm6 = vcmask 720512  }
   0x9   :  { %4 = vst.msk [vmem:[#allocation0] sm:$0x1] %vm3_vm0, %v2_v15   ;;  %vm45_vm7 = vcmask 654912   ;;  %vm51_vm8 = vcmask 589312   ;;  %vm57_vm9 = vcmask 523712   ;;  %vm63_vm10 = vcmask 458112  }
   0xa   :  { %13 = vrot.lane.b32.xlu0 %v102_v3, %s134_s19  ;;  %25 = vrot.lane.b32.xlu1 %v104_v4, %s135_s20  ;;  %vm69_vm11 = vcmask 392512   ;;  %vm75_vm12 = vcmask 326912   ;;  %vm81_vm13 = vcmask 261312   ;;  %vm87_vm14 = vcmask 195712  }
   0xb   :  { %37 = vrot.lane.b32.xlu2 %v106_v5, %s136_s23  ;;  %vm93_vm15 = vcmask 130112  }
  0x12   :  { %43 = vrot.lane.b32.xlu0 %v107_v6, %s137_s28  ;;  %49 = vrot.lane.b32.xlu1 %v108_v7, %s138_s29 }
  0x13   :  { %55 = vrot.lane.b32.xlu2 %v109_v8, %s139_s3 }
  0x1a   :  { %61 = vrot.lane.b32.xlu0 %v110_v9, %s140_s8  ;;  %67 = vrot.lane.b32.xlu1 %v111_v10, %s141_s9 }
  0x1b   :  { %73 = vrot.lane.b32.xlu2 %v112_v11, %s142_s12 }
  0x22   :  { %79 = vrot.lane.b32.xlu0 %v113_v12, %s143_s17  ;;  %85 = vrot.lane.b32.xlu1 %v114_v13, %s144_s18 }
  0x23   :  { %91 = vrot.lane.b32.xlu2 %v115_v14, %s145_s21 }
  0x5d   :  { %v32_v16 = vpop.permute.xlu2 %31  }
  0x65   :  { %v38_v17 = vpop.permute.xlu2 %37  }
  0x6d   :  { %v56_v18 = vpop.permute.xlu2 %55  }
  0x74   :  { %v8_v19 = vpop.permute.xlu0 %7   ;;  %v20_v20 = vpop.permute.xlu1 %19  }
  0x75   :  { %10 = vst.msk [vmem:[#allocation0] sm:$0x1] %vm9_vm1, %v8_v19   ;;  %v74_v21 = vpop.permute.xlu2 %73  }
  0x7c   :  { %v14_v22 = vpop.permute.xlu0 %13   ;;  %v26_v23 = vpop.permute.xlu1 %25  }
  0x7d   :  { %16 = vst.msk [vmem:[#allocation0] sm:$0x1] %vm15_vm2, %v14_v22   ;;  %v92_v24 = vpop.permute.xlu2 %91  }
  0x7e   :  { %22 = vst.msk [vmem:[#allocation0] sm:$0x1] %vm21_vm3, %v20_v20  }
  0x7f   :  { %28 = vst.msk [vmem:[#allocation0] sm:$0x1] %vm27_vm4, %v26_v23  }
  0x80   :  { %34 = vst.msk [vmem:[#allocation0] sm:$0x1] %vm33_vm5, %v32_v16  }
  0x81   :  { %40 = vst.msk [vmem:[#allocation0] sm:$0x1] %vm39_vm6, %v38_v17  }
  0x84   :  { %v44_v25 = vpop.permute.xlu0 %43   ;;  %v50_v26 = vpop.permute.xlu1 %49  }
  0x85   :  { %46 = vst.msk [vmem:[#allocation0] sm:$0x1] %vm45_vm7, %v44_v25  }
  0x86   :  { %52 = vst.msk [vmem:[#allocation0] sm:$0x1] %vm51_vm8, %v50_v26  }
  0x87   :  { %58 = vst.msk [vmem:[#allocation0] sm:$0x1] %vm57_vm9, %v56_v18  }
  0x8c   :  { %v62_v27 = vpop.permute.xlu0 %61   ;;  %v68_v28 = vpop.permute.xlu1 %67  }
  0x8d   :  { %64 = vst.msk [vmem:[#allocation0] sm:$0x1] %vm63_vm10, %v62_v27  }
  0x8e   :  { %70 = vst.msk [vmem:[#allocation0] sm:$0x1] %vm69_vm11, %v68_v28  }
  0x8f   :  { %76 = vst.msk [vmem:[#allocation0] sm:$0x1] %vm75_vm12, %v74_v21  }
  0x94   :  { %v80_v29 = vpop.permute.xlu0 %79   ;;  %v86_v30 = vpop.permute.xlu1 %85  }
  0x95   :  { %82 = vst.msk [vmem:[#allocation0] sm:$0x1] %vm81_vm13, %v80_v29  }
  0x96   :  { %88 = vst.msk [vmem:[#allocation0] sm:$0x1] %vm87_vm14, %v86_v30  }
  0x97   :  { %94 = vst.msk [vmem:[#allocation0] sm:$0x1] %vm93_vm15, %v92_v24  }
  0x9e   :  { %v97_v31 = vld [vmem:[#allocation0] sm:$0x1] }
  0x9f   :  { %100 = vst [vmem:[%s208_s1] sm:$0x1] %v97_v31 }

// kernel: tile.68
= control target key start
LH: loop header
LB: loop body
LE: loop exit
PB: predicated region body
PF: predicated region fallthrough
CT: control target
= control target key end

     0   :  { %s40_s0 = inlined_call_operand.vmem [shape: f32[8], index: 0, kind: input, shape index: {}]   ;;  %s41_s1 = inlined_call_operand.vmem [shape: f32[32,8], index: 1, kind: output, shape index: {}]  }
   0x1   :  { %v4_v0 = vld [vmem:[%s40_s0] ss:$0 sm:$0xff] }
   0x2   :  { %5 = vst [vmem:[%s41_s1] sm:$0xff] %v4_v0 }
   0x3   :  { %12 = vst [vmem:[%s41_s1 + $0x8] sm:$0xff] %v4_v0 }
   0x4   :  { %13 = vst [vmem:[%s41_s1 + $0x10] sm:$0xff] %v4_v0 }
   0x5   :  { %14 = vst [vmem:[%s41_s1 + $0x18] sm:$0xff] %v4_v0 }

// kernel: tile.69
= control target key start
LH: loop header
LB: loop body
LE: loop exit
PB: predicated region body
PF: predicated region fallthrough
CT: control target
= control target key end

     0   :  { %s7_s6 = smov 3  ;;  %s21_s9 = smov 3  ;;  %vm4_vm0 = vcmask 64512   ;;  %vm11_vm1 = vcmask 1048512   ;;  %vm18_vm2 = vcmask 982912   ;;  %vm25_vm3 = vcmask 917312   ;;  %s233_s0 = inlined_call_operand.vmem [shape: f32[32,8], index: 0, kind: input, shape index: {}]   ;;  %s234_s1 = inlined_call_operand.vmem [shape: f32[1,256], index: 1, kind: output, shape index: {}]  }
   0x1   :  { %v123_v0 = vld [vmem:[%s233_s0 + $0xf] ss:$16 sm:%s7_s6]   ;;  %s154_s10 = smov 120   ;;  %v125_v1 = vld [vmem:[%s233_s0 + $0xd] ss:$16 sm:%s21_s9]   ;;  %s155_s13 = smov 104  }
   0x2   :  { %9 = vrot.lane.b32.xlu0 %v123_v0, %s154_s10  ;;  %23 = vrot.lane.b32.xlu1 %v125_v1, %s155_s13  ;;  %s14_s14 = smov 3  ;;  %s28_s15 = smov 3  ;;  %vm32_vm4 = vcmask 851712   ;;  %vm39_vm5 = vcmask 786112   ;;  %vm46_vm6 = vcmask 720512   ;;  %vm53_vm7 = vcmask 654912  }
   0x3   :  { %v124_v2 = vld [vmem:[%s233_s0 + $0xe] ss:$16 sm:%s14_s14]   ;;  %v126_v3 = vld [vmem:[%s233_s0 + $0xc] ss:$16 sm:%s28_s15]   ;;  %s35_s20 = smov 3  ;;  %s156_s23 = smov 112  }
   0x4   :  { %v127_v4 = vld [vmem:[%s233_s0 + $0xb] ss:$16 sm:%s35_s20]   ;;  %s157_s24 = smov 88   ;;  %s158_s25 = smov 96   ;;  %vm60_vm8 = vcmask 589312   ;;  %vm67_vm9 = vcmask 523712  }
   0x5   :  { %37 = vrot.lane.b32.xlu2 %v127_v4, %s157_s24  ;;  %s49_s26 = smov 3  ;;  %s42_s27 = smov 3  ;;  %vm74_vm10 = vcmask 458112   ;;  %vm81_vm11 = vcmask 392512   ;;  %vm88_vm12 = vcmask 326912   ;;  %vm95_vm13 = vcmask 261312  }
   0x6   :  { %s56_s28 = smov 3  ;;  %v129_v5 = vld [vmem:[%s233_s0 + $0x9] ss:$16 sm:%s49_s26]   ;;  %v128_v6 = vld [vmem:[%s233_s0 + $0xa] ss:$16 sm:%s42_s27]   ;;  %s159_s6 = smov 72  }
   0x7   :  { %v130_v7 = vld [vmem:[%s233_s0 + $0x8] ss:$16 sm:%s56_s28]   ;;  %s160_s7 = smov 80   ;;  %s161_s8 = smov 64   ;;  %vm102_vm14 = vcmask 195712   ;;  %vm109_vm15 = vcmask 130112  }
   0x8   :  { %s70_s9 = smov 3  ;;  %s63_s10 = smov 3 }
   0x9   :  { %s77_s11 = smov 3  ;;  %v132_v8 = vld [vmem:[%s233_s0 + $0x6] ss:$16 sm:%s70_s9]   ;;  %v131_v9 = vld [vmem:[%s233_s0 + $0x7] ss:$16 sm:%s63_s10]   ;;  %s162_s18 = smov 48  }
   0xa   :  { %16 = vrot.lane.b32.xlu0 %v124_v2, %s156_s23  ;;  %30 = vrot.lane.b32.xlu1 %v126_v3, %s158_s25  ;;  %v133_v10 = vld [vmem:[%s233_s0 + $0x5] ss:$16 sm:%s77_s11]   ;;  %s163_s19 = smov 56   ;;  %s164_s20 = smov 40  }
   0xb   :  { %s91_s21 = smov 3  ;;  %s84_s22 = smov 3 }
   0xc   :  { %s98_s23 = smov 3  ;;  %v135_v11 = vld [vmem:[%s233_s0 + $0x3] ss:$16 sm:%s91_s21]   ;;  %v134_v12 = vld [vmem:[%s233_s0 + $0x4] ss:$16 sm:%s84_s22]   ;;  %s165_s30 = smov 24  }
   0xd   :  { %44 = vrot.lane.b32.xlu2 %v128_v6, %s160_s7  ;;  %v136_v13 = vld [vmem:[%s233_s0 + $0x2] ss:$16 sm:%s98_s23]   ;;  %s166_s2 = smov 32   ;;  %s167_s3 = smov 16  }
   0xe   :  { %s105_s4 = smov 3  ;;  %s168_s7 = smov 8  }
   0xf   :  { %v137_v14 = vld [vmem:[%s233_s0 + $0x1] ss:$16 sm:%s105_s4]  }
  0x12   :  { %51 = vrot.lane.b32.xlu0 %v129_v5, %s159_s6  ;;  %58 = vrot.lane.b32.xlu1 %v130_v7, %s161_s8  ;;  %s2_s8 = smov 3 }
  0x13   :  { %v3_v15 = vld [vmem:[%s233_s0] ss:$16 sm:%s2_s8]  }
  0x14   :  { %5 = vst.msk [vmem:[#allocation0] ss:$8 sm:$0x3] %vm4_vm0, %v3_v15  }
  0x15   :  { %65 = vrot.lane.b32.xlu2 %v131_v9, %s163_s19 }
  0x1a   :  { %72 = vrot.lane.b32.xlu0 %v132_v8, %s162_s18  ;;  %79 = vrot.lane.b32.xlu1 %v133_v10, %s164_s20 }
  0x1d   :  { %86 = vrot.lane.b32.xlu2 %v134_v12, %s166_s2 }
  0x22   :  { %93 = vrot.lane.b32.xlu0 %v135_v11, %s165_s30  ;;  %100 = vrot.lane.b32.xlu1 %v136_v13, %s167_s3 }
  0x25   :  { %107 = vrot.lane.b32.xlu2 %v137_v14, %s168_s7 }
  0x5f   :  { %v38_v16 = vpop.permute.xlu2 %37  }
  0x67   :  { %v45_v17 = vpop.permute.xlu2 %44  }
  0x6f   :  { %v66_v19 = vpop.permute.xlu2 %65  }
  0x74   :  { %v10_v18 = vpop.permute.xlu0 %9   ;;  %v24_v20 = vpop.permute.xlu1 %23  }
  0x75   :  { %12 = vst.msk [vmem:[#allocation0] ss:$8 sm:$0x3] %vm11_vm1, %v10_v18  }
  0x77   :  { %v87_v22 = vpop.permute.xlu2 %86  }
  0x7c   :  { %v17_v21 = vpop.permute.xlu0 %16   ;;  %v31_v23 = vpop.permute.xlu1 %30  }
  0x7d   :  { %19 = vst.msk [vmem:[#allocation0] ss:$8 sm:$0x3] %vm18_vm2, %v17_v21  }
  0x7e   :  { %26 = vst.msk [vmem:[#allocation0] ss:$8 sm:$0x3] %vm25_vm3, %v24_v20  }
  0x7f   :  { %33 = vst.msk [vmem:[#allocation0] ss:$8 sm:$0x3] %vm32_vm4, %v31_v23   ;;  %v108_v25 = vpop.permute.xlu2 %107  }
  0x80   :  { %40 = vst.msk [vmem:[#allocation0] ss:$8 sm:$0x3] %vm39_vm5, %v38_v16  }
  0x81   :  { %47 = vst.msk [vmem:[#allocation0] ss:$8 sm:$0x3] %vm46_vm6, %v45_v17  }
  0x84   :  { %v52_v24 = vpop.permute.xlu0 %51   ;;  %v59_v26 = vpop.permute.xlu1 %58  }
  0x85   :  { %54 = vst.msk [vmem:[#allocation0] ss:$8 sm:$0x3] %vm53_vm7, %v52_v24  }
  0x86   :  { %61 = vst.msk [vmem:[#allocation0] ss:$8 sm:$0x3] %vm60_vm8, %v59_v26  }
  0x87   :  { %68 = vst.msk [vmem:[#allocation0] ss:$8 sm:$0x3] %vm67_vm9, %v66_v19  }
  0x8c   :  { %v73_v27 = vpop.permute.xlu0 %72   ;;  %v80_v28 = vpop.permute.xlu1 %79  }
  0x8d   :  { %75 = vst.msk [vmem:[#allocation0] ss:$8 sm:$0x3] %vm74_vm10, %v73_v27  }
  0x8e   :  { %82 = vst.msk [vmem:[#allocation0] ss:$8 sm:$0x3] %vm81_vm11, %v80_v28  }
  0x8f   :  { %89 = vst.msk [vmem:[#allocation0] ss:$8 sm:$0x3] %vm88_vm12, %v87_v22  }
  0x94   :  { %v94_v29 = vpop.permute.xlu0 %93   ;;  %v101_v30 = vpop.permute.xlu1 %100  }
  0x95   :  { %96 = vst.msk [vmem:[#allocation0] ss:$8 sm:$0x3] %vm95_vm13, %v94_v29  }
  0x96   :  { %103 = vst.msk [vmem:[#allocation0] ss:$8 sm:$0x3] %vm102_vm14, %v101_v30  }
  0x97   :  { %110 = vst.msk [vmem:[#allocation0] ss:$8 sm:$0x3] %vm109_vm15, %v108_v25  }
  0x9e   :  { %v113_v31 = vld [vmem:[#allocation0] sm:$0x1]  ;;  %v118_v32 = vld [vmem:[#allocation0 + $0x8] sm:$0x1] }
  0x9f   :  { %116 = vst [vmem:[%s234_s1] sm:$0x1] %v113_v31 }
  0xa0   :  { %138 = vst [vmem:[%s234_s1 + $0x1] sm:$0x1] %v118_v32 }

// kernel: unet_up2_forward.6
= control target key start
LH: loop header
LB: loop body
LE: loop exit
PB: predicated region body
PF: predicated region fallthrough
CT: control target
= control target key end

     0   :  { %s481_s12 = smov 0   ;;  %s605_s0 = inlined_call_operand.vmem [shape: bf16[2,8,128], index: 0, kind: input, shape index: {}]   ;;  %s606_s1 = inlined_call_operand.vmem [shape: bf16[128,256], index: 1, kind: input, shape index: {}]   ;;  %s607_s2 = inlined_call_operand.vmem [shape: f32[1,256], index: 2, kind: input, shape index: {}]   ;;  %s608_s3 = inlined_call_operand.vmem [shape: bf16[2,8,256], index: 3, kind: output, shape index: {}]  }
   0x1 LB: > { %s354_s13 = sadd.s32 4294967295, %s459_s12   ;;  %p358_p0 = scmp.ge.s32.totalorder %s459_s12, 1  ;;  %s459_s12 = sphi %s481_s12, %s13_s12  }
   0x2   : > { %p136_p1 = scmp.lt.s32.totalorder %s459_s12, 3 }
   0x4   : > { %p137_p2 = pnand %p358_p0, %p136_p1 }
   0x5   : > { %p159_p3 = scmp.lt.s32.totalorder (!%p137_p2), %s354_s13, 1 }
   0x6   : > { %140 = sbr.rel (%p137_p2) target bundleno = 180 (0xb4), region = 32 }
   0xb   : > { %v420_v0 = vld [vmem:[%s606_s1 + $0x70] sm:$0xf]  ;;  %v444_v1 = vld [vmem:[%s606_s1 + $0x74] sm:$0xf0]  ;;  %v443_v2 = vld [vmem:[%s606_s1 + $0x74] sm:$0xf] }
   0xc   : > { %v421_v3 = vor.u32 %v444_v1, %v420_v0  ;;  %v422_v4 = vld [vmem:[%s606_s1 + $0x78] sm:$0xf0]  ;;  %v412_v5 = vld [vmem:[%s606_s1 + $0x60] sm:$0xf]  ;;  %v442_v6 = vld [vmem:[%s606_s1 + $0x64] sm:$0xf0] }
   0xd   : > { %v425_v7 = vor.u32 %v443_v2, %v422_v4  ;;  %v441_v8 = vld [vmem:[%s606_s1 + $0x64] sm:$0xf]  ;;  %v414_v9 = vld [vmem:[%s606_s1 + $0x68] sm:$0xf0]  ;;  %v413_v10 = vor.u32 %v442_v6, %v412_v5  ;;  %v404_v12 = vld [vmem:[%s606_s1 + $0x50] sm:$0xf] }
   0xe   : > { %271 = vmatpush.bf16.msra.mxu0 %v421_v3  ;;  %v417_v11 = vor.u32 %v441_v8, %v414_v9  ;;  %v440_v13 = vld [vmem:[%s606_s1 + $0x54] sm:$0xf0]  ;;  %v439_v14 = vld [vmem:[%s606_s1 + $0x54] sm:$0xf]  ;;  %v406_v15 = vld [vmem:[%s606_s1 + $0x58] sm:$0xf0] }
   0xf   : > { %284 = vmatpush.bf16.msra.mxu1 %v425_v7  ;;  %v405_v16 = vor.u32 %v440_v13, %v404_v12  ;;  %v409_v17 = vor.u32 %v439_v14, %v406_v15  ;;  %v396_v18 = vld [vmem:[%s606_s1 + $0x40] sm:$0xf]  ;;  %v438_v19 = vld [vmem:[%s606_s1 + $0x44] sm:$0xf0]  ;;  %v437_v20 = vld [vmem:[%s606_s1 + $0x44] sm:$0xf] }
  0x10   : > { %v398_v21 = vld [vmem:[%s606_s1 + $0x48] sm:$0xf0]  ;;  %v397_v22 = vor.u32 %v438_v19, %v396_v18  ;;  %v388_v24 = vld [vmem:[%s606_s1 + $0x30] sm:$0xf]  ;;  %v436_v25 = vld [vmem:[%s606_s1 + $0x34] sm:$0xf0] }
  0x11   : > { %v401_v23 = vor.u32 %v437_v20, %v398_v21  ;;  %v435_v26 = vld [vmem:[%s606_s1 + $0x34] sm:$0xf]  ;;  %v390_v27 = vld [vmem:[%s606_s1 + $0x38] sm:$0xf0]  ;;  %v389_v28 = vor.u32 %v436_v25, %v388_v24  ;;  %v380_v30 = vld [vmem:[%s606_s1 + $0x20] sm:$0xf] }
  0x12   : > { %272 = vmatpush.bf16.msra.mxu0 %v413_v10  ;;  %v393_v29 = vor.u32 %v435_v26, %v390_v27  ;;  %v434_v31 = vld [vmem:[%s606_s1 + $0x24] sm:$0xf0]  ;;  %v433_v32 = vld [vmem:[%s606_s1 + $0x24] sm:$0xf]  ;;  %v382_v33 = vld [vmem:[%s606_s1 + $0x28] sm:$0xf0] }
  0x13   : > { %285 = vmatpush.bf16.msra.mxu1 %v417_v11  ;;  %v381_v34 = vor.u32 %v434_v31, %v380_v30  ;;  %v385_v35 = vor.u32 %v433_v32, %v382_v33  ;;  %v372_v36 = vld [vmem:[%s606_s1 + $0x10] sm:$0xf]  ;;  %v432_v37 = vld [vmem:[%s606_s1 + $0x14] sm:$0xf0]  ;;  %v431_v38 = vld [vmem:[%s606_s1 + $0x14] sm:$0xf] }
  0x14   : > { %v374_v39 = vld [vmem:[%s606_s1 + $0x18] sm:$0xf0]  ;;  %s610_s13 = smov (!%p159_p3, %s354_s13), 1  ;;  %v373_v40 = vor.u32 %v432_v37, %v372_v36  ;;  %v364_v42 = vld [vmem:[%s606_s1] sm:$0xf] }
  0x15   : > { %v377_v41 = vor.u32 %v431_v38, %v374_v39  ;;  %v430_v43 = vld [vmem:[%s606_s1 + $0x4] sm:$0xf0]  ;;  %v429_v44 = vld [vmem:[%s606_s1 + $0x4] sm:$0xf]  ;;  %v366_v45 = vld [vmem:[%s606_s1 + $0x8] sm:$0xf0] }
  0x16   : > { %273 = vmatpush.bf16.msra.mxu0 %v405_v16  ;;  %s359_s28 = sshll.u32 %s610_s13, 2  ;;  %v365_v46 = vor.u32 %v430_v43, %v364_v42  ;;  %v369_v47 = vor.u32 %v429_v44, %v366_v45  ;;  %v185_v49 = vld [vmem:[%s607_s2] sm:$0x3]  ;;  %s428_s7 = sshll.u32 %s610_s13, 3 }
  0x17   : > { %286 = vmatpush.bf16.msra.mxu1 %v409_v17  ;;  %s162_s4 = scalar_lea.vmem %s605_s0, %s359_s28  ;;  %v187_v50 = vperm.slane %v185_v49, 0  ;;  %v188_v51 = vperm.slane %v185_v49, 1  ;;  %s167_s10 = scalar_lea.vmem %s608_s3, %s428_s7 }
  0x18   : > { %v168_v48 = vld [vmem:[%s162_s4] sm:$0xf] }
  0x1a   : > { %274 = vmatpush.bf16.msra.mxu0 %v397_v22 }
  0x1b   : > { %287 = vmatpush.bf16.msra.mxu1 %v401_v23 }
  0x1e   : > { %275 = vmatpush.bf16.msra.mxu0 %v389_v28 }
  0x1f   : > { %288 = vmatpush.bf16.msra.mxu1 %v393_v29 }
  0x22   : > { %276 = vmatpush.bf16.msra.mxu0 %v381_v34 }
  0x23   : > { %289 = vmatpush.bf16.msra.mxu1 %v385_v35 }
  0x26   : > { %277 = vmatpush.bf16.msra.mxu0 %v373_v40 }
  0x27   : > { %290 = vmatpush.bf16.msra.mxu1 %v377_v41 }
  0x2a   : > { %278 = vmatpush.bf16.msra.mxu0 %v365_v46 }
  0x2b   : > { %291 = vmatpush.bf16.msra.mxu1 %v369_v47 }
  0x2d   : > { %279 = vmatmul.bf16.vlgmr.msra.gmra.mxu0 %v168_v48 }
  0x2e   : > { %292 = vmatmul.bf16.vlgmr.msra.gmra.mxu1 %v168_v48 }
  0xaa   : > { %v280_v52 = vpop.f32.mrf.mxu0 }
  0xab   : > { %v281_v53 = vadd.f32 %v280_v52, %v187_v50  ;;  %v293_v54 = vpop.f32.mrf.mxu1 }
  0xac   : > { %v294_v55 = vadd.f32 %v293_v54, %v188_v51 }
  0xae   : > { %v297_v56 = vpack.c.bf16 %v294_v55, %v281_v53 }
  0xb0   : > { %298 = vst [vmem:[%s167_s10] sm:$0xff] %v297_v56 }
  0xb2   : > { %v282_v57 = vpop.f32.mrf.mxu0 }
  0xb3   : > { %v295_v58 = vpop.f32.mrf.mxu1 }
  0xb4 PF: > { %s13_s12 = sadd.s32 1, %s459_s12  }
  0xb5   : > { %p10_p4 = scmp.ge.s32.totalorder %s13_s12, 4  }
  0xb7   :  { %12 = sbr.rel (!%p10_p4) target bundleno = 1 (0x1), region = 62 }

// kernel: unet_up2_forward.7
= control target key start
LH: loop header
LB: loop body
LE: loop exit
PB: predicated region body
PF: predicated region fallthrough
CT: control target
= control target key end

     0   :  { %s996_s24 = smov 0   ;;  %s1111_s0 = inlined_call_operand.vmem [shape: bf16[2,16,128], index: 0, kind: input, shape index: {}]   ;;  %s1112_s1 = inlined_call_operand.vmem [shape: f32[1,128], index: 1, kind: input, shape index: {}]   ;;  %s1113_s2 = inlined_call_operand.vmem [shape: f32[1,128], index: 2, kind: input, shape index: {}]   ;;  %s1114_s3 = inlined_call_operand.vmem [shape: bf16[3,128,128], index: 3, kind: input, shape index: {}]   ;;  %s1115_s4 = inlined_call_operand.vmem [shape: f32[1,128], index: 4, kind: input, shape index: {}]   ;;  %s1116_s5 = inlined_call_operand.vmem [shape: bf16[2,16,128], index: 5, kind: output, shape index: {0}]   ;;  %s1117_s6 = inlined_call_operand.vmem [shape: f32[2,1,128], index: 6, kind: output, shape index: {1}]   ;;  %s1118_s7 = inlined_call_operand.vmem [shape: f32[2,1,128], index: 7, kind: output, shape index: {2}]  }
   0x1 LB: > { %s754_s1 = sadd.s32 4294967295, %s953_s24   ;;  %p758_p0 = scmp.ge.s32.totalorder %s953_s24, 1  ;;  %s953_s24 = sphi %s996_s24, %s18_s24  }
   0x2   : > { %p242_p1 = scmp.lt.s32.totalorder %s953_s24, 3 }
   0x4   : > { %p243_p2 = pnand %p758_p0, %p242_p1 }
   0x5   : > { %p280_p3 = scmp.lt.s32.totalorder (!%p243_p2), %s754_s1, 1 }
   0x6   : > { %246 = sbr.rel (%p243_p2) target bundleno = 355 (0x163), region = 40 }
   0xb   : > { %v915_v0 = vld [vmem:[%s1114_s3 + $0x38] sm:$0xff]  ;;  %v914_v2 = vld [vmem:[%s1114_s3 + $0x30] sm:$0xff]  ;;  %v913_v5 = vld [vmem:[%s1114_s3 + $0x28] sm:$0xff]  ;;  %s1120_s1 = smov (!%p280_p3, %s754_s1), 1  ;;  %v478_v25 = vlaneseq  ;;  %v955_v32 = vmov 0.0   ;;  %vm564_vm1 = vcmask 130048  }
   0xc   : > { %v931_v1 = vld [vmem:[%s1114_s3 + $0xb8] sm:$0xff]  ;;  %368 = vmatpush.bf16.msra.mxu0 %v915_v0  ;;  %v930_v3 = vld [vmem:[%s1114_s3 + $0xb0] sm:$0xff]  ;;  %v929_v6 = vld [vmem:[%s1114_s3 + $0xa8] sm:$0xff]  ;;  %s905_s16 = sshll.u32 %s1120_s1, 3  ;;  %s292_s14 = scalar_lea.vmem %s1117_s6, %s1120_s1 }
   0xd   : > { %464 = vmatpush.bf16.msra.mxu1 %v931_v1  ;;  %v923_v4 = vld [vmem:[%s1114_s3 + $0x78] sm:$0xff]  ;;  %v922_v7 = vld [vmem:[%s1114_s3 + $0x70] sm:$0xff]  ;;  %v912_v8 = vld [vmem:[%s1114_s3 + $0x20] sm:$0xff]  ;;  %s284_s25 = scalar_lea.vmem %s1111_s0, %s905_s16  ;;  %v482_v26 = vand.u32 127, %v478_v25  ;;  %v479_v29 = vshrl.u32 %v478_v25, 7  ;;  %s289_s11 = scalar_lea.vmem %s1116_s5, %s905_s16 }
   0xe   : > { %550 = vmatpush.bf16.msra.mxu2 %v923_v4  ;;  %v928_v9 = vld [vmem:[%s1114_s3 + $0xa0] sm:$0xff]  ;;  %v921_v10 = vld [vmem:[%s1114_s3 + $0x68] sm:$0xff]  ;;  %v911_v11 = vld [vmem:[%s1114_s3 + $0x18] sm:$0xff]  ;;  %s295_s17 = scalar_lea.vmem %s1118_s7, %s1120_s1 }
   0xf   : > { %v927_v12 = vld [vmem:[%s1114_s3 + $0x98] sm:$0xff]  ;;  %v920_v13 = vld [vmem:[%s1114_s3 + $0x60] sm:$0xff]  ;;  %v910_v14 = vld [vmem:[%s1114_s3 + $0x10] sm:$0xff]  ;;  %v483_v30 = vadd.s32 1, %v482_v26  ;;  %v480_v35 = vadd.s32 8, %v479_v29  ;;  %v490_v37 = vadd.s32 1, %v479_v29 }
  0x10   : > { %369 = vmatpush.bf16.msra.mxu0 %v914_v2  ;;  %v926_v15 = vld [vmem:[%s1114_s3 + $0x90] sm:$0xff]  ;;  %v919_v16 = vld [vmem:[%s1114_s3 + $0x58] sm:$0xff]  ;;  %v909_v17 = vld [vmem:[%s1114_s3 + $0x8] sm:$0xff] }
  0x11   : > { %465 = vmatpush.bf16.msra.mxu1 %v930_v3  ;;  %v925_v18 = vld [vmem:[%s1114_s3 + $0x88] sm:$0xff]  ;;  %v918_v19 = vld [vmem:[%s1114_s3 + $0x50] sm:$0xff]  ;;  %v908_v20 = vld [vmem:[%s1114_s3] sm:$0xff]  ;;  %vm484_vm0 = vcmp.eq.s32.totalorder %v479_v29, %v483_v30  ;;  %vm485_vm2 = vcmp.eq.s32.totalorder %v480_v35, %v483_v30  ;;  %vm492_vm3 = vcmp.eq.s32.totalorder %v482_v26, %v490_v37  ;;  %v491_v39 = vadd.s32 1, %v480_v35 }
  0x12   : > { %551 = vmatpush.bf16.msra.mxu2 %v922_v7  ;;  %v924_v21 = vld [vmem:[%s1114_s3 + $0x80] sm:$0xff]  ;;  %v917_v23 = vld [vmem:[%s1114_s3 + $0x48] sm:$0xff]  ;;  %v863_v33 = vsel %vm484_vm0, 1.0, %v955_v32  ;;  %v864_v36 = vsel %vm485_vm2, 1.0, %v955_v32  ;;  %v865_v38 = vsel %vm492_vm3, 1.0, %v955_v32 }
  0x13   : > { %v907_v22 = vld [vmem:[%s284_s25] sm:$0xff]  ;;  %vm493_vm4 = vcmp.eq.s32.totalorder %v482_v26, %v491_v39 }
  0x14   : > { %370 = vmatpush.bf16.msra.mxu0 %v913_v5  ;;  %v916_v24 = vld [vmem:[%s1114_s3 + $0x40] sm:$0xff]  ;;  %v866_v40 = vsel %vm493_vm4, 1.0, %v955_v32 }
  0x15   : > { %466 = vmatpush.bf16.msra.mxu1 %v929_v6  ;;  %v946_v44 = vld [vmem:[%s1115_s4] ss:$0 sm:$0xff] }
  0x16   : > { %552 = vmatpush.bf16.msra.mxu2 %v921_v10 }
  0x18   : > { %371 = vmatpush.bf16.msra.mxu0 %v912_v8 }
  0x19   : > { %467 = vmatpush.bf16.msra.mxu1 %v928_v9 }
  0x1a   : > { %553 = vmatpush.bf16.msra.mxu2 %v920_v13 }
  0x1c   : > { %372 = vmatpush.bf16.msra.mxu0 %v911_v11 }
  0x1d   : > { %468 = vmatpush.bf16.msra.mxu1 %v927_v12 }
  0x1e   : > { %554 = vmatpush.bf16.msra.mxu2 %v919_v16 }
  0x20   : > { %373 = vmatpush.bf16.msra.mxu0 %v910_v14 }
  0x21   : > { %469 = vmatpush.bf16.msra.mxu1 %v926_v15 }
  0x22   : > { %555 = vmatpush.bf16.msra.mxu2 %v918_v19 }
  0x24   : > { %374 = vmatpush.bf16.msra.mxu0 %v909_v17 }
  0x25   : > { %470 = vmatpush.bf16.msra.mxu1 %v925_v18 }
  0x26   : > { %556 = vmatpush.bf16.msra.mxu2 %v917_v23 }
  0x28   : > { %375 = vmatpush.bf16.msra.mxu0 %v908_v20 }
  0x29   : > { %471 = vmatpush.bf16.msra.mxu1 %v924_v21 }
  0x2a   : > { %557 = vmatpush.bf16.msra.mxu2 %v916_v24 }
  0x2b   : > { %376 = vmatmul.bf16.vlgmr.msra.gmra.mxu0 %v907_v22 }
  0x2c   : > { %472 = vmatmul.bf16.vlgmr.msra.gmra.mxu1 %v907_v22 }
  0x2d   : > { %558 = vmatmul.bf16.vlgmr.msra.gmra.mxu2 %v907_v22 }
  0xa8   : > { %v377_v27 = vpop.f32.mrf.mxu0 }
  0xa9   : > { %v473_v28 = vpop.f32.mrf.mxu1 }
  0xb0   : > { %v379_v31 = vpop.f32.mrf.mxu0  ;;  %v559_v42 = vpop.f32.mrf.mxu2 }
  0xb1   : > { %585 = vmatpush.msra.mxu3 %v379_v31  ;;  %v475_v34 = vpop.f32.mrf.mxu1  ;;  %v560_v47 = vadd.f32 %v946_v44, %v559_v42 }
  0xb3   : > { %586 = vmatpush.msra.mxu3 %v377_v27 }
  0xb4   : > { %899 = vmatmul.msk.f32.vlgmr.msra.gmra.mxu3 %vm564_vm1, %v863_v33 }
  0xb5   : > { %616 = vmatpush.msrb.mxu3 %v475_v34 }
  0xb7   : > { %617 = vmatpush.msrb.mxu3 %v473_v28 }
  0xb8   : > { %v561_v45 = vpop.f32.mrf.mxu2 }
  0xb9   : > { %v562_v48 = vadd.f32 %v946_v44, %v561_v45 }
  0xbc   : > { %900 = vmatmul.msk.f32.gmra.mxu3 %vm564_vm1, %v864_v36 }
  0xc4   : > { %901 = vmatmul.msk.f32.vlgmr.msrb.gmra.mxu3 %vm564_vm1, %v865_v38 }
  0xcc   : > { %902 = vmatmul.msk.f32.gmra.mxu3 %vm564_vm1, %v866_v40 }
 0x137   : > { %v588_v41 = vpop.f32.mrf.mxu3 }
 0x138   : > { %v594_v49 = vadd.f32 %v588_v41, %v560_v47 }
 0x13f   : > { %v591_v43 = vpop.f32.mrf.mxu3 }
 0x140   : > { %v595_v50 = vadd.f32 %v591_v43, %v562_v48 }
 0x147   : > { %v619_v46 = vpop.f32.mrf.mxu3 }
 0x148   : > { %v625_v51 = vadd.f32 %v619_v46, %v594_v49 }
 0x14a   : > { %v639_v54 = vmul.f32 %v625_v51, %v625_v51 }
 0x14f   : > { %v622_v52 = vpop.f32.mrf.mxu3 }
 0x150   : > { %v626_v53 = vadd.f32 %v622_v52, %v595_v50 }
 0x152   : > { %v935_v55 = vpack.c.bf16 %v626_v53, %v625_v51  ;;  %v631_v56 = vadd.f32 %v626_v53, %v625_v51  ;;  %v640_v57 = vmul.f32 %v626_v53, %v626_v53 }
 0x154   : > { %936 = vst [vmem:[%s289_s11] sm:$0xff] %v935_v55   ;;  %v632_v58 = vrot.slane %v631_v56, 4  ;;  %v641_v59 = vadd.f32 %v640_v57, %v639_v54 }
 0x156   : > { %v633_v60 = vadd.f32 %v632_v58, %v631_v56  ;;  %v642_v61 = vrot.slane %v641_v59, 4 }
 0x158   : > { %v634_v62 = vrot.slane %v633_v60, 2  ;;  %v643_v63 = vadd.f32 %v642_v61, %v641_v59 }
 0x15a   : > { %v635_v0 = vadd.f32 %v634_v62, %v633_v60  ;;  %v644_v1 = vrot.slane %v643_v63, 2 }
 0x15c   : > { %v636_v2 = vrot.slane %v635_v0, 1  ;;  %v645_v3 = vadd.f32 %v644_v1, %v643_v63 }
 0x15e   : > { %v637_v4 = vadd.f32 %v636_v2, %v635_v0  ;;  %v646_v5 = vrot.slane %v645_v3, 1 }
 0x160   : > { %638 = vst [vmem:[%s292_s14] sm:$0x1] %v637_v4  ;;  %v647_v6 = vadd.f32 %v646_v5, %v645_v3 }
 0x162   : > { %648 = vst [vmem:[%s295_s17] sm:$0x1] %v647_v6 }
 0x163 PF: > { %s18_s24 = sadd.s32 1, %s953_s24  }
 0x164   : > { %p15_p4 = scmp.ge.s32.totalorder %s18_s24, 4  }
 0x166   :  { %17 = sbr.rel (!%p15_p4) target bundleno = 1 (0x1), region = 96 }

// kernel: unet_up2_forward.8
= control target key start
LH: loop header
LB: loop body
LE: loop exit
PB: predicated region body
PF: predicated region fallthrough
CT: control target
= control target key end

     0   :  { %s1096_s24 = smov 0   ;;  %s1229_s0 = inlined_call_operand.vmem [shape: bf16[2,16,128], index: 0, kind: input, shape index: {}]   ;;  %s1230_s1 = inlined_call_operand.vmem [shape: f32[1,128], index: 1, kind: input, shape index: {}]   ;;  %s1231_s2 = inlined_call_operand.vmem [shape: f32[1,128], index: 2, kind: input, shape index: {}]   ;;  %s1232_s3 = inlined_call_operand.vmem [shape: bf16[3,128,128], index: 3, kind: input, shape index: {}]   ;;  %s1233_s4 = inlined_call_operand.vmem [shape: f32[1,128], index: 4, kind: input, shape index: {}]   ;;  %s1234_s5 = inlined_call_operand.vmem [shape: bf16[2,16,128], index: 5, kind: output, shape index: {0}]   ;;  %s1235_s6 = inlined_call_operand.vmem [shape: f32[2,1,128], index: 6, kind: output, shape index: {1}]   ;;  %s1236_s7 = inlined_call_operand.vmem [shape: f32[2,1,128], index: 7, kind: output, shape index: {2}]  }
   0x1 LB: > { %s843_s25 = sadd.s32 4294967295, %s1052_s24   ;;  %p847_p0 = scmp.ge.s32.totalorder %s1052_s24, 1  ;;  %s1052_s24 = sphi %s1096_s24, %s18_s24  }
   0x2   : > { %p242_p1 = scmp.lt.s32.totalorder %s1052_s24, 3 }
   0x4   : > { %p243_p2 = pnand %p847_p0, %p242_p1 }
   0x5   : > { %p280_p3 = scmp.lt.s32.totalorder (!%p243_p2), %s843_s25, 1 }
   0x6   : > { %246 = sbr.rel (%p243_p2) target bundleno = 389 (0x185), region = 40 }
   0xb   : > { %v999_v0 = vld [vmem:[%s1232_s3 + $0x38] sm:$0xff]  ;;  %v998_v2 = vld [vmem:[%s1232_s3 + $0x30] sm:$0xff]  ;;  %s1238_s25 = smov (!%p280_p3, %s843_s25), 1  ;;  %v997_v4 = vld [vmem:[%s1232_s3 + $0x28] sm:$0xff]  ;;  %vm653_vm11 = vcmask 130048  }
   0xc   : > { %v1015_v1 = vld [vmem:[%s1232_s3 + $0xb8] sm:$0xff]  ;;  %457 = vmatpush.bf16.msra.mxu0 %v999_v0  ;;  %v1014_v3 = vld [vmem:[%s1232_s3 + $0xb0] sm:$0xff]  ;;  %s990_s11 = sshll.u32 %s1238_s25, 3  ;;  %v1035_v5 = vld [vmem:[%s1230_s1] ss:$0 sm:$0xff]  ;;  %s295_s30 = scalar_lea.vmem %s1236_s7, %s1238_s25 }
   0xd   : > { %553 = vmatpush.bf16.msra.mxu1 %v1015_v1  ;;  %s284_s16 = scalar_lea.vmem %s1229_s0, %s990_s11  ;;  %v1013_v6 = vld [vmem:[%s1232_s3 + $0xa8] sm:$0xff]  ;;  %v1036_v10 = vld [vmem:[%s1231_s2] ss:$0 sm:$0xff]  ;;  %v995_v19 = vld [vmem:[%s1232_s3 + $0x18] sm:$0xff]  ;;  %s289_s23 = scalar_lea.vmem %s1234_s5, %s990_s11 }
   0xe   : > { %v1017_v7 = vld [vmem:[%s284_s16] sm:$0xff]   ;;  %v1011_v20 = vld [vmem:[%s1232_s3 + $0x98] sm:$0xff]  ;;  %v994_v25 = vld [vmem:[%s1232_s3 + $0x10] sm:$0xff]  ;;  %s292_s11 = scalar_lea.vmem %s1235_s6, %s1238_s25 }
   0xf   : > { %v1018_v8 = vunpack.c.l.bf16 %v1017_v7  ;;  %v1019_v9 = vunpack.c.h.bf16 %v1017_v7  ;;  %v996_v13 = vld [vmem:[%s1232_s3 + $0x20] sm:$0xff]  ;;  %v1010_v26 = vld [vmem:[%s1232_s3 + $0x90] sm:$0xff]  ;;  %v993_v29 = vld [vmem:[%s1232_s3 + $0x8] sm:$0xff] }
  0x10   : > { %458 = vmatpush.bf16.msra.mxu0 %v998_v2  ;;  %v1012_v14 = vld [vmem:[%s1232_s3 + $0xa0] sm:$0xff]  ;;  %v1009_v30 = vld [vmem:[%s1232_s3 + $0x88] sm:$0xff]  ;;  %v1007_v54 = vld [vmem:[%s1232_s3 + $0x78] sm:$0xff] }
  0x11   : > { %554 = vmatpush.bf16.msra.mxu1 %v1014_v3  ;;  %v304_v11 = vmul.f32 %v1035_v5, %v1018_v8  ;;  %v305_v12 = vmul.f32 %v1035_v5, %v1019_v9  ;;  %v992_v31 = vld [vmem:[%s1232_s3] sm:$0xff]  ;;  %639 = vmatpush.bf16.msra.mxu2 %v1007_v54  ;;  %v1006_v59 = vld [vmem:[%s1232_s3 + $0x70] sm:$0xff]  ;;  %v1005_v2 = vld [vmem:[%s1232_s3 + $0x68] sm:$0xff] }
  0x12   : > { %v1008_v32 = vld [vmem:[%s1232_s3 + $0x80] sm:$0xff] }
  0x13   : > { %v1142_v15 = vadd.f32 %v1036_v10, %v304_v11  ;;  %v1144_v16 = vadd.f32 %v1036_v10, %v305_v12  ;;  %v1004_v8 = vld [vmem:[%s1232_s3 + $0x60] sm:$0xff] }
  0x14   : > { %459 = vmatpush.bf16.msra.mxu0 %v997_v4 }
  0x15   : > { %555 = vmatpush.bf16.msra.mxu1 %v1013_v6  ;;  %v1147_v17 = vmul.f32 0.70710677, %v1142_v15  ;;  %v1150_v18 = vmul.f32 0.70710677, %v1144_v16  ;;  %640 = vmatpush.bf16.msra.mxu2 %v1006_v59 }
  0x17   : > { %v320_v21 = vand.u32 2147483647, %v1147_v17  ;;  %v321_v22 = vand.u32 2147483647, %v1150_v18  ;;  %vm316_vm8 = vcmp.ge.f32.partialorder %v1147_v17, 0.0  ;;  %vm317_vm9 = vcmp.ge.f32.partialorder %v1150_v18, 0.0 }
  0x18   : > { %460 = vmatpush.bf16.msra.mxu0 %v996_v13  ;;  %v1003_v13 = vld [vmem:[%s1232_s3 + $0x58] sm:$0xff] }
  0x19   : > { %556 = vmatpush.bf16.msra.mxu1 %v1012_v14  ;;  %v322_v23 = vmul.f32 0.3275911, %v320_v21  ;;  %v323_v24 = vmul.f32 0.3275911, %v321_v22  ;;  %v374_v49 = vsub.f32 0.0, %v320_v21  ;;  %v375_v51 = vsub.f32 0.0, %v321_v22  ;;  %641 = vmatpush.bf16.msra.mxu2 %v1005_v2 }
  0x1b   : > { %v324_v27 = vadd.f32 1.0, %v322_v23  ;;  %v325_v28 = vadd.f32 1.0, %v323_v24  ;;  %v376_v58 = vmul.f32 %v374_v49, %v320_v21  ;;  %v377_v61 = vmul.f32 %v375_v51, %v321_v22  ;;  %v1002_v24 = vld [vmem:[%s1232_s3 + $0x50] sm:$0xff] }
  0x1c   : > { %461 = vmatpush.bf16.msra.mxu0 %v995_v19 }
  0x1d   : > { %557 = vmatpush.bf16.msra.mxu1 %v1011_v20  ;;  %1038 = vrcp.f32 %v324_v27  ;;  %vm331_vm0 = vweird.f32 %v324_v27  ;;  %v337_v36 = vand.u32 2147483648, %v324_v27  ;;  %v335_v39 = vand.u32 2147483647, %v324_v27  ;;  %642 = vmatpush.bf16.msra.mxu2 %v1004_v8 }
  0x1e   : > { %1040 = vrcp.f32 %v325_v28  ;;  %v352_v40 = vand.u32 2147483648, %v325_v28  ;;  %vm346_vm2 = vweird.f32 %v325_v28  ;;  %v350_v42 = vand.u32 2147483647, %v325_v28 }
  0x1f   : > { %v338_v44 = vor.u32 1.1754944e-38, %v337_v36  ;;  %vm336_vm5 = vcmp.eq.f32.partialorder %v335_v39, 8.507059e+37  ;;  %v378_v1 = vmul.f32 1.442695, %v376_v58  ;;  %v380_v4 = vmul.f32 1.442695, %v377_v61 }
  0x20   : > { %462 = vmatpush.bf16.msra.mxu0 %v994_v25  ;;  %v353_v47 = vor.u32 1.1754944e-38, %v352_v40  ;;  %vm351_vm7 = vcmp.eq.f32.partialorder %v350_v42, 8.507059e+37  ;;  %v1001_v39 = vld [vmem:[%s1232_s3 + $0x48] sm:$0xff]  ;;  %v1037_v58 = vld [vmem:[%s1233_s4] ss:$0 sm:$0xff] }
  0x21   : > { %558 = vmatpush.bf16.msra.mxu1 %v1010_v26  ;;  %1042 = vpow2.f32 %v378_v1  ;;  %643 = vmatpush.bf16.msra.mxu2 %v1003_v13  ;;  %v1054_v26 = vmov -1.0  }
  0x22   : > { %1044 = vpow2.f32 %v380_v4 }
  0x23   : > { %v1039_v33 = vpop.eup %1038 }
  0x24   : > { %463 = vmatpush.bf16.msra.mxu0 %v993_v29  ;;  %v1041_v34 = vpop.eup %1040  ;;  %v327_v35 = vmul.f32 %v1039_v33, %v324_v27  ;;  %vm332_vm1 = vweird.f32 %v1039_v33  ;;  %v318_v27 = vsel %vm316_vm8, 1.0, %v1054_v26  ;;  %v319_v29 = vsel %vm317_vm9, 1.0, %v1054_v26 }
  0x25   : > { %559 = vmatpush.bf16.msra.mxu1 %v1009_v30  ;;  %v342_v37 = vmul.f32 %v1041_v34, %v325_v28  ;;  %vm347_vm3 = vweird.f32 %v1041_v34  ;;  %vm333_vm4 = vmor %vm331_vm0, %vm332_vm1  ;;  %644 = vmatpush.bf16.msra.mxu2 %v1002_v24 }
  0x26   : > { %v328_v38 = vsub.f32 1.0, %v327_v35  ;;  %vm348_vm6 = vmor %vm346_vm2, %vm347_vm3 }
  0x27   : > { %v343_v41 = vsub.f32 1.0, %v342_v37  ;;  %v1043_v19 = vpop.eup %1042 }
  0x28   : > { %464 = vmatpush.bf16.msra.mxu0 %v992_v31  ;;  %v329_v43 = vmul.f32 %v1039_v33, %v328_v38  ;;  %v1045_v21 = vpop.eup %1044 }
  0x29   : > { %560 = vmatpush.bf16.msra.mxu1 %v1008_v32  ;;  %v344_v45 = vmul.f32 %v1041_v34, %v343_v41  ;;  %v312_v32 = vmul.f32 0.5, %v1142_v15  ;;  %645 = vmatpush.bf16.msra.mxu2 %v1001_v39  ;;  %v1000_v15 = vld [vmem:[%s1232_s3 + $0x40] sm:$0xff] }
  0x2a   : > { %v330_v46 = vadd.f32 %v1039_v33, %v329_v43 }
  0x2b   : > { %v345_v48 = vadd.f32 %v1041_v34, %v344_v45 }
  0x2c   : > { %v334_v50 = vsel %vm333_vm4, %v1039_v33, %v330_v46  ;;  %v313_v33 = vmul.f32 0.5, %v1144_v16  ;;  %v567_v16 = vlaneseq  ;;  %v1055_v46 = vmov 0.0  }
  0x2d   : > { %v339_v52 = vsel %vm336_vm5, %v338_v44, %v334_v50  ;;  %v349_v53 = vsel %vm348_vm6, %v1041_v34, %v345_v48  ;;  %646 = vmatpush.bf16.msra.mxu2 %v1000_v15 }
  0x2e   : > { %v354_v55 = vsel %vm351_vm7, %v353_v47, %v349_v53  ;;  %v356_v56 = vmul.f32 1.0614054, %v339_v52  ;;  %v571_v40 = vand.u32 127, %v567_v16  ;;  %v568_v43 = vshrl.u32 %v567_v16, 7 }
  0x2f   : > { %v357_v57 = vmul.f32 1.0614054, %v354_v55 }
  0x30   : > { %v358_v60 = vadd.f32 -1.4531521, %v356_v56  ;;  %v572_v44 = vadd.s32 1, %v571_v40  ;;  %v569_v49 = vadd.s32 8, %v568_v43  ;;  %v579_v51 = vadd.s32 1, %v568_v43 }
  0x31   : > { %v359_v62 = vadd.f32 -1.4531521, %v357_v57 }
  0x32   : > { %v360_v63 = vmul.f32 %v358_v60, %v339_v52  ;;  %vm573_vm10 = vcmp.eq.s32.totalorder %v568_v43, %v572_v44  ;;  %vm574_vm12 = vcmp.eq.s32.totalorder %v569_v49, %v572_v44  ;;  %vm581_vm13 = vcmp.eq.s32.totalorder %v571_v40, %v579_v51 }
  0x33   : > { %v361_v0 = vmul.f32 %v359_v62, %v354_v55  ;;  %v948_v47 = vsel %vm573_vm10, 1.0, %v1055_v46  ;;  %v949_v50 = vsel %vm574_vm12, 1.0, %v1055_v46  ;;  %v580_v53 = vadd.s32 1, %v569_v49 }
  0x34   : > { %v362_v3 = vadd.f32 1.4214138, %v360_v63 }
  0x35   : > { %v363_v5 = vadd.f32 1.4214138, %v361_v0  ;;  %vm582_vm14 = vcmp.eq.s32.totalorder %v571_v40, %v580_v53 }
  0x36   : > { %v364_v6 = vmul.f32 %v362_v3, %v339_v52  ;;  %v951_v54 = vsel %vm582_vm14, 1.0, %v1055_v46 }
  0x37   : > { %v365_v7 = vmul.f32 %v363_v5, %v354_v55 }
  0x38   : > { %v366_v9 = vadd.f32 -0.28449672, %v364_v6 }
  0x39   : > { %v367_v10 = vadd.f32 -0.28449672, %v365_v7 }
  0x3a   : > { %v368_v11 = vmul.f32 %v366_v9, %v339_v52 }
  0x3b   : > { %v369_v12 = vmul.f32 %v367_v10, %v354_v55 }
  0x3c   : > { %v370_v14 = vadd.f32 0.2548296, %v368_v11 }
  0x3d   : > { %v371_v20 = vadd.f32 0.2548296, %v369_v12 }
  0x3e   : > { %v372_v22 = vmul.f32 %v370_v14, %v339_v52  ;;  %v950_v52 = vsel %vm581_vm13, 1.0, %v1055_v46 }
  0x3f   : > { %v373_v23 = vmul.f32 %v371_v20, %v354_v55 }
  0x40   : > { %v382_v25 = vmul.f32 %v1043_v19, %v372_v22 }
  0x41   : > { %v383_v28 = vmul.f32 %v1045_v21, %v373_v23 }
  0x42   : > { %v384_v30 = vsub.f32 1.0, %v382_v25 }
  0x43   : > { %v385_v31 = vsub.f32 1.0, %v383_v28 }
  0x44   : > { %v386_v17 = vmul.f32 %v384_v30, %v318_v27 }
  0x45   : > { %v387_v18 = vmul.f32 %v385_v31, %v319_v29 }
  0x46   : > { %v388_v34 = vadd.f32 1.0, %v386_v17 }
  0x47   : > { %v389_v35 = vadd.f32 1.0, %v387_v18 }
  0x48   : > { %v390_v36 = vmul.f32 %v388_v34, %v312_v32 }
  0x49   : > { %v391_v37 = vmul.f32 %v389_v35, %v313_v33 }
  0x4b   : > { %v392_v38 = vpack.c.bf16 %v391_v37, %v390_v36 }
  0x4d   : > { %465 = vmatmul.bf16.vlgmr.msra.gmra.mxu0 %v392_v38  ;;  %561 = vmatmul.bf16.vlgmr.msra.gmra.mxu1 %v392_v38 }
  0x4e   : > { %647 = vmatmul.bf16.vlgmr.msra.gmra.mxu2 %v392_v38 }
  0xca   : > { %v466_v41 = vpop.f32.mrf.mxu0  ;;  %v562_v42 = vpop.f32.mrf.mxu1 }
  0xd1   : > { %v648_v56 = vpop.f32.mrf.mxu2 }
  0xd2   : > { %v468_v45 = vpop.f32.mrf.mxu0  ;;  %v564_v48 = vpop.f32.mrf.mxu1  ;;  %v649_v61 = vadd.f32 %v1037_v58, %v648_v56 }
  0xd3   : > { %674 = vmatpush.msra.mxu3 %v468_v45 }
  0xd5   : > { %675 = vmatpush.msra.mxu3 %v466_v41 }
  0xd6   : > { %984 = vmatmul.msk.f32.vlgmr.msra.gmra.mxu3 %vm653_vm11, %v948_v47 }
  0xd7   : > { %705 = vmatpush.msrb.mxu3 %v564_v48 }
  0xd9   : > { %706 = vmatpush.msrb.mxu3 %v562_v42  ;;  %v650_v59 = vpop.f32.mrf.mxu2 }
  0xda   : > { %v651_v62 = vadd.f32 %v1037_v58, %v650_v59 }
  0xde   : > { %985 = vmatmul.msk.f32.gmra.mxu3 %vm653_vm11, %v949_v50 }
  0xe6   : > { %986 = vmatmul.msk.f32.vlgmr.msrb.gmra.mxu3 %vm653_vm11, %v950_v52 }
  0xee   : > { %987 = vmatmul.msk.f32.gmra.mxu3 %vm653_vm11, %v951_v54 }
 0x159   : > { %v677_v55 = vpop.f32.mrf.mxu3 }
 0x15a   : > { %v683_v63 = vadd.f32 %v677_v55, %v649_v61 }
 0x161   : > { %v680_v57 = vpop.f32.mrf.mxu3 }
 0x162   : > { %v684_v0 = vadd.f32 %v680_v57, %v651_v62 }
 0x169   : > { %v708_v60 = vpop.f32.mrf.mxu3 }
 0x16a   : > { %v714_v1 = vadd.f32 %v708_v60, %v683_v63 }
 0x16c   : > { %v728_v4 = vmul.f32 %v714_v1, %v714_v1 }
 0x171   : > { %v711_v2 = vpop.f32.mrf.mxu3 }
 0x172   : > { %v715_v3 = vadd.f32 %v711_v2, %v684_v0 }
 0x174   : > { %v1023_v5 = vpack.c.bf16 %v715_v3, %v714_v1  ;;  %v720_v6 = vadd.f32 %v715_v3, %v714_v1  ;;  %v729_v7 = vmul.f32 %v715_v3, %v715_v3 }
 0x176   : > { %1024 = vst [vmem:[%s289_s23] sm:$0xff] %v1023_v5   ;;  %v721_v8 = vrot.slane %v720_v6, 4  ;;  %v730_v9 = vadd.f32 %v729_v7, %v728_v4 }
 0x178   : > { %v722_v10 = vadd.f32 %v721_v8, %v720_v6  ;;  %v731_v11 = vrot.slane %v730_v9, 4 }
 0x17a   : > { %v723_v12 = vrot.slane %v722_v10, 2  ;;  %v732_v13 = vadd.f32 %v731_v11, %v730_v9 }
 0x17c   : > { %v724_v14 = vadd.f32 %v723_v12, %v722_v10  ;;  %v733_v19 = vrot.slane %v732_v13, 2 }
 0x17e   : > { %v725_v20 = vrot.slane %v724_v14, 1  ;;  %v734_v21 = vadd.f32 %v733_v19, %v732_v13 }
 0x180   : > { %v726_v22 = vadd.f32 %v725_v20, %v724_v14  ;;  %v735_v23 = vrot.slane %v734_v21, 1 }
 0x182   : > { %727 = vst [vmem:[%s292_s11] sm:$0x1] %v726_v22  ;;  %v736_v24 = vadd.f32 %v735_v23, %v734_v21 }
 0x184   : > { %737 = vst [vmem:[%s295_s30] sm:$0x1] %v736_v24 }
 0x185 PF: > { %s18_s24 = sadd.s32 1, %s1052_s24  }
 0x186   : > { %p15_p4 = scmp.ge.s32.totalorder %s18_s24, 4  }
 0x188   :  { %17 = sbr.rel (!%p15_p4) target bundleno = 1 (0x1), region = 96 }

// kernel: unet_up2_forward.11
= control target key start
LH: loop header
LB: loop body
LE: loop exit
PB: predicated region body
PF: predicated region fallthrough
CT: control target
= control target key end

     0   :  { %s389_s12 = smov 0   ;;  %s432_s0 = inlined_call_operand.vmem [shape: bf16[2,16,128], index: 0, kind: input, shape index: {}]   ;;  %s433_s1 = inlined_call_operand.vmem [shape: f32[1,128], index: 1, kind: input, shape index: {}]   ;;  %s434_s2 = inlined_call_operand.vmem [shape: f32[1,128], index: 2, kind: input, shape index: {}]   ;;  %s435_s3 = inlined_call_operand.vmem [shape: f32[2,16,128], index: 3, kind: output, shape index: {}]  }
   0x1 LB: > { %s324_s13 = sadd.s32 4294967295, %s366_s12   ;;  %p328_p0 = scmp.ge.s32.totalorder %s366_s12, 1  ;;  %s366_s12 = sphi %s389_s12, %s13_s12  }
   0x2   : > { %p137_p1 = scmp.lt.s32.totalorder %s366_s12, 3 }
   0x4   : > { %p138_p2 = pnand %p328_p0, %p137_p1 }
   0x5   : > { %p161_p3 = scmp.lt.s32.totalorder (!%p138_p2), %s324_s13, 1 }
   0x6   : > { %141 = sbr.rel (%p138_p2) target bundleno = 76 (0x4c), region = 32 }
   0xb   : > { %s437_s13 = smov (!%p161_p3, %s324_s13), 1  ;;  %v350_v0 = vld [vmem:[%s433_s1] ss:$0 sm:$0xff] }
   0xc   : > { %s335_s14 = sshll.u32 %s437_s13, 3  ;;  %v351_v4 = vld [vmem:[%s434_s2] ss:$0 sm:$0xff]  ;;  %s336_s22 = sshll.u32 %s437_s13, 4 }
   0xd   : > { %s165_s17 = scalar_lea.vmem %s432_s0, %s335_s14  ;;  %s170_s25 = scalar_lea.vmem %s435_s3, %s336_s22 }
   0xe   : > { %v338_v1 = vld [vmem:[%s165_s17] sm:$0xff]  }
   0xf   : > { %v339_v2 = vunpack.c.l.bf16 %v338_v1  ;;  %v340_v3 = vunpack.c.h.bf16 %v338_v1 }
  0x11   : > { %v179_v5 = vmul.f32 %v350_v0, %v339_v2  ;;  %v180_v6 = vmul.f32 %v350_v0, %v340_v3  ;;  %v368_v0 = vmov -1.0  }
  0x13   : > { %v409_v7 = vadd.f32 %v351_v4, %v179_v5  ;;  %v411_v8 = vadd.f32 %v351_v4, %v180_v6 }
  0x15   : > { %v414_v9 = vmul.f32 0.70710677, %v409_v7  ;;  %v417_v10 = vmul.f32 0.70710677, %v411_v8  ;;  %v187_v6 = vmul.f32 0.5, %v409_v7 }
  0x17   : > { %v195_v11 = vand.u32 2147483647, %v414_v9  ;;  %v196_v12 = vand.u32 2147483647, %v417_v10  ;;  %vm191_vm8 = vcmp.ge.f32.partialorder %v414_v9, 0.0  ;;  %vm192_vm9 = vcmp.ge.f32.partialorder %v417_v10, 0.0 }
  0x18   : > { %v193_v1 = vsel %vm191_vm8, 1.0, %v368_v0  ;;  %v194_v4 = vsel %vm192_vm9, 1.0, %v368_v0 }
  0x19   : > { %v197_v13 = vmul.f32 0.3275911, %v195_v11  ;;  %v198_v14 = vmul.f32 0.3275911, %v196_v12  ;;  %v249_v32 = vsub.f32 0.0, %v195_v11  ;;  %v250_v35 = vsub.f32 0.0, %v196_v12 }
  0x1b   : > { %v199_v15 = vadd.f32 1.0, %v197_v13  ;;  %v200_v16 = vadd.f32 1.0, %v198_v14  ;;  %v251_v40 = vmul.f32 %v249_v32, %v195_v11  ;;  %v252_v43 = vmul.f32 %v250_v35, %v196_v12 }
  0x1c   : > { %v188_v12 = vmul.f32 0.5, %v411_v8 }
  0x1d   : > { %352 = vrcp.f32 %v199_v15  ;;  %vm206_vm0 = vweird.f32 %v199_v15  ;;  %v212_v20 = vand.u32 2147483648, %v199_v15  ;;  %v210_v23 = vand.u32 2147483647, %v199_v15 }
  0x1e   : > { %354 = vrcp.f32 %v200_v16  ;;  %v227_v24 = vand.u32 2147483648, %v200_v16  ;;  %vm221_vm2 = vweird.f32 %v200_v16  ;;  %v225_v26 = vand.u32 2147483647, %v200_v16 }
  0x1f   : > { %v213_v28 = vor.u32 1.1754944e-38, %v212_v20  ;;  %vm211_vm5 = vcmp.eq.f32.partialorder %v210_v23, 8.507059e+37  ;;  %v253_v46 = vmul.f32 1.442695, %v251_v40  ;;  %v255_v49 = vmul.f32 1.442695, %v252_v43 }
  0x20   : > { %v228_v31 = vor.u32 1.1754944e-38, %v227_v24  ;;  %vm226_vm7 = vcmp.eq.f32.partialorder %v225_v26, 8.507059e+37 }
  0x21   : > { %356 = vpow2.f32 %v253_v46 }
  0x22   : > { %358 = vpow2.f32 %v255_v49 }
  0x23   : > { %v353_v17 = vpop.eup %352 }
  0x24   : > { %v355_v18 = vpop.eup %354  ;;  %v202_v19 = vmul.f32 %v353_v17, %v199_v15  ;;  %vm207_vm1 = vweird.f32 %v353_v17 }
  0x25   : > { %v217_v21 = vmul.f32 %v355_v18, %v200_v16  ;;  %vm222_vm3 = vweird.f32 %v355_v18  ;;  %vm208_vm4 = vmor %vm206_vm0, %vm207_vm1 }
  0x26   : > { %v203_v22 = vsub.f32 1.0, %v202_v19  ;;  %vm223_vm6 = vmor %vm221_vm2, %vm222_vm3 }
  0x27   : > { %v218_v25 = vsub.f32 1.0, %v217_v21  ;;  %v357_v58 = vpop.eup %356 }
  0x28   : > { %v204_v27 = vmul.f32 %v353_v17, %v203_v22  ;;  %v359_v60 = vpop.eup %358 }
  0x29   : > { %v219_v29 = vmul.f32 %v355_v18, %v218_v25 }
  0x2a   : > { %v205_v30 = vadd.f32 %v353_v17, %v204_v27 }
  0x2b   : > { %v220_v33 = vadd.f32 %v355_v18, %v219_v29 }
  0x2c   : > { %v209_v34 = vsel %vm208_vm4, %v353_v17, %v205_v30 }
  0x2d   : > { %v214_v36 = vsel %vm211_vm5, %v213_v28, %v209_v34  ;;  %v224_v37 = vsel %vm223_vm6, %v355_v18, %v220_v33 }
  0x2e   : > { %v231_v38 = vmul.f32 1.0614054, %v214_v36  ;;  %v229_v39 = vsel %vm226_vm7, %v228_v31, %v224_v37 }
  0x2f   : > { %v232_v41 = vmul.f32 1.0614054, %v229_v39 }
  0x30   : > { %v233_v42 = vadd.f32 -1.4531521, %v231_v38 }
  0x31   : > { %v234_v44 = vadd.f32 -1.4531521, %v232_v41 }
  0x32   : > { %v235_v45 = vmul.f32 %v233_v42, %v214_v36 }
  0x33   : > { %v236_v47 = vmul.f32 %v234_v44, %v229_v39 }
  0x34   : > { %v237_v48 = vadd.f32 1.4214138, %v235_v45 }
  0x35   : > { %v238_v50 = vadd.f32 1.4214138, %v236_v47 }
  0x36   : > { %v239_v51 = vmul.f32 %v237_v48, %v214_v36 }
  0x37   : > { %v240_v52 = vmul.f32 %v238_v50, %v229_v39 }
  0x38   : > { %v241_v53 = vadd.f32 -0.28449672, %v239_v51 }
  0x39   : > { %v242_v54 = vadd.f32 -0.28449672, %v240_v52 }
  0x3a   : > { %v243_v55 = vmul.f32 %v241_v53, %v214_v36 }
  0x3b   : > { %v244_v56 = vmul.f32 %v242_v54, %v229_v39 }
  0x3c   : > { %v245_v57 = vadd.f32 0.2548296, %v243_v55 }
  0x3d   : > { %v246_v59 = vadd.f32 0.2548296, %v244_v56 }
  0x3e   : > { %v247_v61 = vmul.f32 %v245_v57, %v214_v36 }
  0x3f   : > { %v248_v62 = vmul.f32 %v246_v59, %v229_v39 }
  0x40   : > { %v257_v63 = vmul.f32 %v357_v58, %v247_v61 }
  0x41   : > { %v258_v2 = vmul.f32 %v359_v60, %v248_v62 }
  0x42   : > { %v259_v3 = vsub.f32 1.0, %v257_v63 }
  0x43   : > { %v260_v5 = vsub.f32 1.0, %v258_v2 }
  0x44   : > { %v261_v11 = vmul.f32 %v259_v3, %v193_v1 }
  0x45   : > { %v262_v13 = vmul.f32 %v260_v5, %v194_v4 }
  0x46   : > { %v263_v14 = vadd.f32 1.0, %v261_v11 }
  0x47   : > { %v264_v9 = vadd.f32 1.0, %v262_v13 }
  0x48   : > { %v265_v10 = vmul.f32 %v263_v14, %v187_v6 }
  0x49   : > { %v266_v15 = vmul.f32 %v264_v9, %v188_v12 }
  0x4a   : > { %267 = vst [vmem:[%s170_s25] sm:$0xff] %v265_v10 }
  0x4b   : > { %268 = vst [vmem:[%s170_s25 + $0x8] sm:$0xff] %v266_v15 }
  0x4c PF: > { %s13_s12 = sadd.s32 1, %s366_s12  }
  0x4d   : > { %p10_p4 = scmp.ge.s32.totalorder %s13_s12, 4  }
  0x4f   :  { %12 = sbr.rel (!%p10_p4) target bundleno = 1 (0x1), region = 62 }

</bundles_post_ra>
